<compile_context>
chip_gen: v7x
topology: tpu7x:2x2x1
jax: 0.10.0
libtpu: 0.0.40
codegen_flags: <defaults>
</compile_context>

<pallas_src>
import jax
import jax.numpy as jnp
from jax import lax
from jax.experimental import pallas as pl
from jax.experimental.pallas import tpu as pltpu


# ----------------------------------------------------------------------------------
# Input-projection kernels: one big matmul per layer, grid=(2,) over directions.
# ----------------------------------------------------------------------------------
def _inproj1_kernel(x_ref, w_ref, b_ref, gx_ref):
    # x_ref: (M, Din), w_ref: (Din, 4H), b_ref: (1, 4H), gx_ref: (M, 4H)
    gx_ref[...] = (jnp.dot(x_ref[...], w_ref[...],
                           preferred_element_type=jnp.float32) + b_ref[...])


def _inproj2_kernel(xf_ref, xb_ref, wf_ref, wb_ref, b_ref, gx_ref):
    # Layer-1 input is concat(fwd_seq, bwd_seq); instead of materializing the concat
    # in HBM we split W_ih into two (H, 4H) halves and sum two matmuls.
    gx_ref[...] = (jnp.dot(xf_ref[...], wf_ref[...],
                           preferred_element_type=jnp.float32)
                   + jnp.dot(xb_ref[...], wb_ref[...],
                             preferred_element_type=jnp.float32)
                   + b_ref[...])


def input_projection_l0(x2d, w_ih, b):
    """x2d (M, Din), w_ih (2, Din, 4H), b (2, 1, 4H) -> (2, M, 4H)."""
    M, Din = x2d.shape
    G = w_ih.shape[-1]
    return pl.pallas_call(
        _inproj1_kernel,
        out_shape=jax.ShapeDtypeStruct((2, M, G), jnp.float32),
        grid_spec=pltpu.PrefetchScalarGridSpec(
            num_scalar_prefetch=0,
            grid=(2,),
            in_specs=[
                pl.BlockSpec((M, Din), lambda d: (0, 0)),
                pl.BlockSpec((None, Din, G), lambda d: (d, 0, 0)),
                pl.BlockSpec((None, 1, G), lambda d: (d, 0, 0)),
            ],
            out_specs=pl.BlockSpec((None, M, G), lambda d: (d, 0, 0)),
        ),
        compiler_params=pltpu.CompilerParams(
            dimension_semantics=("parallel",)),
    )(x2d, w_ih, b)


def input_projection_l1(xf2d, xb2d, w_f, w_b, b):
    """xf2d/xb2d (M, H), w_f/w_b (2, H, 4H), b (2, 1, 4H) -> (2, M, 4H)."""
    M, H = xf2d.shape
    G = w_f.shape[-1]
    return pl.pallas_call(
        _inproj2_kernel,
        out_shape=jax.ShapeDtypeStruct((2, M, G), jnp.float32),
        grid_spec=pltpu.PrefetchScalarGridSpec(
            num_scalar_prefetch=0,
            grid=(2,),
            in_specs=[
                pl.BlockSpec((M, H), lambda d: (0, 0)),
                pl.BlockSpec((M, H), lambda d: (0, 0)),
                pl.BlockSpec((None, H, G), lambda d: (d, 0, 0)),
                pl.BlockSpec((None, H, G), lambda d: (d, 0, 0)),
                pl.BlockSpec((None, 1, G), lambda d: (d, 0, 0)),
            ],
            out_specs=pl.BlockSpec((None, M, G), lambda d: (d, 0, 0)),
        ),
        compiler_params=pltpu.CompilerParams(
            dimension_semantics=("parallel",)),
    )(xf2d, xb2d, w_f, w_b, b)


# ----------------------------------------------------------------------------------
# Recurrent kernels: whole sequence resident in VMEM, time loop inside the body,
# grid=(2,) over directions (independent -> "parallel").
# ----------------------------------------------------------------------------------
def _lstm_scan(gx_ref, whh_ref, hseq_ref):
    """Run the full-time LSTM recurrence for one direction; return the last hidden.

    gx_ref  : (T, B, 4H)  precomputed x @ W_ih + bias, natural time order
    whh_ref : (H, 4H)
    hseq_ref: (T, B, H) output ref, or None when only the last hidden is needed
    Direction = pl.program_id(0): 0 -> forward in time, 1 -> reverse in time.
    """
    d = pl.program_id(0)
    T, B, _ = gx_ref.shape
    H = whh_ref.shape[0]
    whh = whh_ref[...]                              # hoisted: loaded once

    def step(t, carry):
        h, c = carry
        # Reverse direction via indexing -- no HBM reversal of the sequence.
        tt = jnp.where(d == 0, t, T - 1 - t)
        gates = gx_ref[tt] + jnp.dot(h, whh, preferred_element_type=jnp.float32)
        i_g = jax.nn.sigmoid(gates[:, 0 * H:1 * H])
        f_g = jax.nn.sigmoid(gates[:, 1 * H:2 * H])
        g_g = jnp.tanh(gates[:, 2 * H:3 * H])
        o_g = jax.nn.sigmoid(gates[:, 3 * H:4 * H])
        c_new = f_g * c + i_g * g_g
        h_new = o_g * jnp.tanh(c_new)
        if hseq_ref is not None:
            hseq_ref[tt] = h_new                    # natural time order for both dirs
        return h_new, c_new

    h0 = jnp.zeros((B, H), jnp.float32)
    c0 = jnp.zeros((B, H), jnp.float32)
    h_last, _ = lax.fori_loop(0, T, step, (h0, c0), unroll=(T <= 32))
    return h_last


def _lstm_seq_kernel(gx_ref, whh_ref, hseq_ref):
    _lstm_scan(gx_ref, whh_ref, hseq_ref)


def _lstm_last_kernel(gx_ref, whh_ref, hlast_ref):
    hlast_ref[...] = _lstm_scan(gx_ref, whh_ref, None)


def bilstm_layer_seq(gx, w_hh):
    """gx (2, T, B, 4H), w_hh (2, H, 4H) -> hseq (2, T, B, H) (natural time order)."""
    _, T, B, G = gx.shape
    H = w_hh.shape[1]
    return pl.pallas_call(
        _lstm_seq_kernel,
        out_shape=jax.ShapeDtypeStruct((2, T, B, H), jnp.float32),
        grid_spec=pltpu.PrefetchScalarGridSpec(
            num_scalar_prefetch=0,
            grid=(2,),
            in_specs=[
                pl.BlockSpec((None, T, B, G), lambda d: (d, 0, 0, 0)),
                pl.BlockSpec((None, H, G), lambda d: (d, 0, 0)),
            ],
            out_specs=pl.BlockSpec((None, T, B, H), lambda d: (d, 0, 0, 0)),
        ),
        compiler_params=pltpu.CompilerParams(
            dimension_semantics=("parallel",)),
    )(gx, w_hh)


def bilstm_layer_last(gx, w_hh):
    """gx (2, T, B, 4H), w_hh (2, H, 4H) -> hlast (2, B, H) (no sequence writeback)."""
    _, T, B, G = gx.shape
    H = w_hh.shape[1]
    return pl.pallas_call(
        _lstm_last_kernel,
        out_shape=jax.ShapeDtypeStruct((2, B, H), jnp.float32),
        grid_spec=pltpu.PrefetchScalarGridSpec(
            num_scalar_prefetch=0,
            grid=(2,),
            in_specs=[
                pl.BlockSpec((None, T, B, G), lambda d: (d, 0, 0, 0)),
                pl.BlockSpec((None, H, G), lambda d: (d, 0, 0)),
            ],
            out_specs=pl.BlockSpec((None, B, H), lambda d: (d, 0, 0)),
        ),
        compiler_params=pltpu.CompilerParams(
            dimension_semantics=("parallel",)),
    )(gx, w_hh)


# ----------------------------------------------------------------------------------
# Final linear head: consumes the (2, B, H) last-hidden stack directly (no concat).
# ----------------------------------------------------------------------------------
def _head_kernel(h_ref, w_ref, b_ref, o_ref):
    # h_ref: (2, B, H) [0 = ht[-2] (layer-1 fwd), 1 = ht[-1] (layer-1 bwd)]
    # w_ref: (2, H, 1), b_ref: (1, 1), o_ref: (B, 1)
    o_ref[...] = (jnp.dot(h_ref[0], w_ref[0], preferred_element_type=jnp.float32)
                  + jnp.dot(h_ref[1], w_ref[1], preferred_element_type=jnp.float32)
                  + b_ref[...])


def linear_head(h_last, lin_w, lin_b):
    B = h_last.shape[1]
    vmem = pl.BlockSpec(memory_space=pltpu.MemorySpace.VMEM)
    return pl.pallas_call(
        _head_kernel,
        out_shape=jax.ShapeDtypeStruct((B, 1), jnp.float32),
        in_specs=[vmem, vmem, vmem],
        out_specs=vmem,
    )(h_last, lin_w, lin_b)


# ----------------------------------------------------------------------------------
# Parameters (PyTorch layout -> kernel layout) and forward pass.
# ----------------------------------------------------------------------------------
def init_params(key, vocab_size, embedding_dim, hidden_dim):
    E, H = embedding_dim, hidden_dim
    ks = jax.random.split(key, 24)
    ki = iter(range(24))

    def uni(k, shape, scale):
        return jax.random.uniform(k, shape, jnp.float32, -scale, scale)

    # Embedding (vocab+1, E), padding_idx=0 row zeroed (matches nn.Embedding).
    emb = jax.random.normal(ks[next(ki)], (vocab_size + 1, E), jnp.float32)
    emb = emb.at[0].set(0.0)

    s = 1.0 / float(H) ** 0.5

    def lstm_dir(din):
        w_ih = uni(ks[next(ki)], (4 * H, din), s)   # PyTorch layout (4H, Din)
        w_hh = uni(ks[next(ki)], (4 * H, H), s)
        b_ih = uni(ks[next(ki)], (4 * H,), s)
        b_hh = uni(ks[next(ki)], (4 * H,), s)
        return w_ih.T, w_hh.T, (b_ih + b_hh).reshape(1, 4 * H)

    wih0_f, whh0_f, b0_f = lstm_dir(E)          # layer 0, forward
    wih0_b, whh0_b, b0_b = lstm_dir(E)          # layer 0, backward
    wih1_f, whh1_f, b1_f = lstm_dir(2 * H)      # layer 1, forward
    wih1_b, whh1_b, b1_b = lstm_dir(2 * H)      # layer 1, backward

    sl = 1.0 / float(2 * H) ** 0.5
    lin_w = uni(ks[next(ki)], (2 * H, 1), sl)
    lin_b = uni(ks[next(ki)], (1, 1), sl)

    return {
        "emb": emb,
        # layer 0: fwd/bwd stacked on the leading (direction) axis
        "w_ih0": jnp.stack([wih0_f, wih0_b]),            # (2, E, 4H)
        "w_hh0": jnp.stack([whh0_f, whh0_b]),            # (2, H, 4H)
        "b0": jnp.stack([b0_f, b0_b]),                   # (2, 1, 4H)
        # layer 1: W_ih split along its 2H input into fwd/bwd halves of layer-0 output
        "w_ih1_f": jnp.stack([wih1_f[:H], wih1_b[:H]]),  # (2, H, 4H)
        "w_ih1_b": jnp.stack([wih1_f[H:], wih1_b[H:]]),  # (2, H, 4H)
        "w_hh1": jnp.stack([whh1_f, whh1_b]),            # (2, H, 4H)
        "b1": jnp.stack([b1_f, b1_b]),                   # (2, 1, 4H)
        # head: (2H, 1) split into per-direction halves (dir0 -> ht[-2], dir1 -> ht[-1])
        "lin_w": jnp.stack([lin_w[:H], lin_w[H:]]),      # (2, H, 1)
        "lin_b": lin_b,                                  # (1, 1)
    }


def lstm_model_forward(params, tokens):
    """tokens: (B, T) int32 -> (B,) float32  (matches PyTorch LSTMModel.forward)."""
    B, T = tokens.shape
    H = params["w_hh0"].shape[1]
    E = params["emb"].shape[1]

    # Embedding lookup (glue; gather).  padding_idx=0 row is zero in the table.
    emb = params["emb"][tokens]                      # (B, T, E)
    x_tm = jnp.transpose(emb, (1, 0, 2))             # (T, B, E) time-major
    x2d = x_tm.reshape(T * B, E)

    # ---- layer 0 (bidirectional): hoisted input projection + in-VMEM recurrence ----
    gx0 = input_projection_l0(x2d, params["w_ih0"], params["b0"])      # (2, T*B, 4H)
    gx0 = gx0.reshape(2, T, B, 4 * H)
    hseq0 = bilstm_layer_seq(gx0, params["w_hh0"])                     # (2, T, B, H)

    # ---- layer 1 (bidirectional): only the final hidden states are needed ----
    hf2d = hseq0[0].reshape(T * B, H)
    hb2d = hseq0[1].reshape(T * B, H)
    gx1 = input_projection_l1(hf2d, hb2d, params["w_ih1_f"],
                              params["w_ih1_b"], params["b1"])         # (2, T*B, 4H)
    gx1 = gx1.reshape(2, T, B, 4 * H)
    hlast1 = bilstm_layer_last(gx1, params["w_hh1"])                   # (2, B, H)

    out = linear_head(hlast1, params["lin_w"], params["lin_b"])        # (B, 1)
    return out.reshape(-1)                                             # (B,)


if __name__ == "__main__":
    # Small shapes consistent with the module's forward.
    B, T = 2, 8
    embedding_dim = 32
    hidden_dim = 32
    vocab_size = 50

    key = jax.random.PRNGKey(0)
    k_param, k_tok = jax.random.split(key)
    params = init_params(k_param, vocab_size, embedding_dim, hidden_dim)
    tokens = jax.random.randint(k_tok, (B, T), 0, vocab_size + 1, dtype=jnp.int32)

    out = jax.jit(lstm_model_forward)(params, tokens)
    jax.block_until_ready(out)
    assert out.shape == (B,) and out.dtype == jnp.float32
    print("KERNEL_OK")
</pallas_src>

<mosaic_0001>
module attributes {stable_mosaic.version = 11 : i64} {
  func.func @_inproj2_kernel(%arg0: i32, %arg1: memref<16x32xf32, #tpu.memory_space<vmem>>, %arg2: memref<16x32xf32, #tpu.memory_space<vmem>>, %arg3: memref<1x32x128xf32, #tpu.memory_space<vmem>>, %arg4: memref<1x32x128xf32, #tpu.memory_space<vmem>>, %arg5: memref<1x1x128xf32, #tpu.memory_space<vmem>>, %arg6: memref<1x16x128xf32, #tpu.memory_space<vmem>>) attributes {dimension_semantics = [#tpu.dimension_semantics<parallel>], iteration_bounds = array<i64: 2>, scalar_prefetch = 0 : i64, scratch_operands = 0 : i64, tpu.core_type = #tpu.core_type<tc>, window_params = [{pipeline_mode = #tpu.pipeline_mode<synchronous>, transform_indices = @transform_0, window_bounds = array<i64: 16, 32>}, {pipeline_mode = #tpu.pipeline_mode<synchronous>, transform_indices = @transform_1, window_bounds = array<i64: 16, 32>}, {transform_indices = @transform_2, window_bounds = array<i64: 1, 32, 128>}, {transform_indices = @transform_3, window_bounds = array<i64: 1, 32, 128>}, {transform_indices = @transform_4, window_bounds = array<i64: 1, 1, 128>}, {transform_indices = @transform_5, window_bounds = array<i64: 1, 16, 128>}]} {
    %c0 = arith.constant 0 : index
    %c0_0 = arith.constant 0 : index
    %0 = vector.load %arg1[%c0, %c0_0] : memref<16x32xf32, #tpu.memory_space<vmem>>, vector<16x32xf32>
    %c0_1 = arith.constant 0 : index
    %c0_2 = arith.constant 0 : index
    %c0_3 = arith.constant 0 : index
    %1 = vector.load %arg3[%c0_1, %c0_2, %c0_3] : memref<1x32x128xf32, #tpu.memory_space<vmem>>, vector<1x32x128xf32>
    %2 = vector.shape_cast %1 : vector<1x32x128xf32> to vector<32x128xf32>
    %cst = arith.constant dense<0.000000e+00> : vector<16x128xf32>
    %3 = tpu.matmul %0, %2, %cst {dimension_numbers = #tpu.dot_dimension_numbers<[1], [0], [0], [1], [0, 0, 1, 1], [], []>} : vector<16x32xf32>, vector<32x128xf32>, vector<16x128xf32> -> vector<16x128xf32>
    %c0_4 = arith.constant 0 : index
    %c0_5 = arith.constant 0 : index
    %4 = vector.load %arg2[%c0_4, %c0_5] : memref<16x32xf32, #tpu.memory_space<vmem>>, vector<16x32xf32>
    %c0_6 = arith.constant 0 : index
    %c0_7 = arith.constant 0 : index
    %c0_8 = arith.constant 0 : index
    %5 = vector.load %arg4[%c0_6, %c0_7, %c0_8] : memref<1x32x128xf32, #tpu.memory_space<vmem>>, vector<1x32x128xf32>
    %6 = vector.shape_cast %5 : vector<1x32x128xf32> to vector<32x128xf32>
    %cst_9 = arith.constant dense<0.000000e+00> : vector<16x128xf32>
    %7 = tpu.matmul %4, %6, %cst_9 {dimension_numbers = #tpu.dot_dimension_numbers<[1], [0], [0], [1], [0, 0, 1, 1], [], []>} : vector<16x32xf32>, vector<32x128xf32>, vector<16x128xf32> -> vector<16x128xf32>
    %8 = arith.addf %3, %7 : vector<16x128xf32>
    %c0_10 = arith.constant 0 : index
    %c0_11 = arith.constant 0 : index
    %c0_12 = arith.constant 0 : index
    %9 = vector.load %arg5[%c0_10, %c0_11, %c0_12] : memref<1x1x128xf32, #tpu.memory_space<vmem>>, vector<1x1x128xf32>
    %10 = vector.shape_cast %9 : vector<1x1x128xf32> to vector<1x128xf32>
    %11 = vector.broadcast %10 : vector<1x128xf32> to vector<16x128xf32>
    %12 = arith.addf %8, %11 : vector<16x128xf32>
    %c0_13 = arith.constant 0 : index
    %c0_14 = arith.constant 0 : index
    %c0_15 = arith.constant 0 : index
    %13 = vector.load %arg6[%c0_13, %c0_14, %c0_15] : memref<1x16x128xf32, #tpu.memory_space<vmem>>, vector<1x16x128xf32>
    %14 = vector.shape_cast %13 : vector<1x16x128xf32> to vector<16x128xf32>
    %15 = vector.shape_cast %12 : vector<16x128xf32> to vector<1x16x128xf32>
    tpu.vector_store %arg6[%c0_13, %c0_14, %c0_15], %15 {strides = array<i32>} : memref<1x16x128xf32, #tpu.memory_space<vmem>>, vector<1x16x128xf32>,
    return
  }
  func.func @transform_0(%arg0: i32) -> (i32, i32) {
    %c0_i32 = arith.constant 0 : i32
    %c0_i32_0 = arith.constant 0 : i32
    %c0_i32_1 = arith.constant 0 : i32
    return %c0_i32, %c0_i32_0 : i32, i32
  }
  func.func @transform_1(%arg0: i32) -> (i32, i32) {
    %c0_i32 = arith.constant 0 : i32
    %c0_i32_0 = arith.constant 0 : i32
    %c0_i32_1 = arith.constant 0 : i32
    return %c0_i32, %c0_i32_0 : i32, i32
  }
  func.func @transform_2(%arg0: i32) -> (i32, i32, i32) {
    %c0_i32 = arith.constant 0 : i32
    %c0_i32_0 = arith.constant 0 : i32
    %c0_i32_1 = arith.constant 0 : i32
    return %arg0, %c0_i32, %c0_i32_0 : i32, i32, i32
  }
  func.func @transform_3(%arg0: i32) -> (i32, i32, i32) {
    %c0_i32 = arith.constant 0 : i32
    %c0_i32_0 = arith.constant 0 : i32
    %c0_i32_1 = arith.constant 0 : i32
    return %arg0, %c0_i32, %c0_i32_0 : i32, i32, i32
  }
  func.func @transform_4(%arg0: i32) -> (i32, i32, i32) {
    %c0_i32 = arith.constant 0 : i32
    %c0_i32_0 = arith.constant 0 : i32
    %c0_i32_1 = arith.constant 0 : i32
    return %arg0, %c0_i32, %c0_i32_0 : i32, i32, i32
  }
  func.func @transform_5(%arg0: i32) -> (i32, i32, i32) {
    %c0_i32 = arith.constant 0 : i32
    %c0_i32_0 = arith.constant 0 : i32
    %c0_i32_1 = arith.constant 0 : i32
    return %arg0, %c0_i32, %c0_i32_0 : i32, i32, i32
  }
}

module attributes {stable_mosaic.version = 11 : i64} {
  func.func @_inproj1_kernel(%arg0: i32, %arg1: memref<16x32xf32, #tpu.memory_space<vmem>>, %arg2: memref<1x32x128xf32, #tpu.memory_space<vmem>>, %arg3: memref<1x1x128xf32, #tpu.memory_space<vmem>>, %arg4: memref<1x16x128xf32, #tpu.memory_space<vmem>>) attributes {dimension_semantics = [#tpu.dimension_semantics<parallel>], iteration_bounds = array<i64: 2>, scalar_prefetch = 0 : i64, scratch_operands = 0 : i64, tpu.core_type = #tpu.core_type<tc>, window_params = [{pipeline_mode = #tpu.pipeline_mode<synchronous>, transform_indices = @transform_0, window_bounds = array<i64: 16, 32>}, {transform_indices = @transform_1, window_bounds = array<i64: 1, 32, 128>}, {transform_indices = @transform_2, window_bounds = array<i64: 1, 1, 128>}, {transform_indices = @transform_3, window_bounds = array<i64: 1, 16, 128>}]} {
    %c0 = arith.constant 0 : index
    %c0_0 = arith.constant 0 : index
    %0 = vector.load %arg1[%c0, %c0_0] : memref<16x32xf32, #tpu.memory_space<vmem>>, vector<16x32xf32>
    %c0_1 = arith.constant 0 : index
    %c0_2 = arith.constant 0 : index
    %c0_3 = arith.constant 0 : index
    %1 = vector.load %arg2[%c0_1, %c0_2, %c0_3] : memref<1x32x128xf32, #tpu.memory_space<vmem>>, vector<1x32x128xf32>
    %2 = vector.shape_cast %1 : vector<1x32x128xf32> to vector<32x128xf32>
    %cst = arith.constant dense<0.000000e+00> : vector<16x128xf32>
    %3 = tpu.matmul %0, %2, %cst {dimension_numbers = #tpu.dot_dimension_numbers<[1], [0], [0], [1], [0, 0, 1, 1], [], []>} : vector<16x32xf32>, vector<32x128xf32>, vector<16x128xf32> -> vector<16x128xf32>
    %c0_4 = arith.constant 0 : index
    %c0_5 = arith.constant 0 : index
    %c0_6 = arith.constant 0 : index
    %4 = vector.load %arg3[%c0_4, %c0_5, %c0_6] : memref<1x1x128xf32, #tpu.memory_space<vmem>>, vector<1x1x128xf32>
    %5 = vector.shape_cast %4 : vector<1x1x128xf32> to vector<1x128xf32>
    %6 = vector.broadcast %5 : vector<1x128xf32> to vector<16x128xf32>
    %7 = arith.addf %3, %6 : vector<16x128xf32>
    %c0_7 = arith.constant 0 : index
    %c0_8 = arith.constant 0 : index
    %c0_9 = arith.constant 0 : index
    %8 = vector.load %arg4[%c0_7, %c0_8, %c0_9] : memref<1x16x128xf32, #tpu.memory_space<vmem>>, vector<1x16x128xf32>
    %9 = vector.shape_cast %8 : vector<1x16x128xf32> to vector<16x128xf32>
    %10 = vector.shape_cast %7 : vector<16x128xf32> to vector<1x16x128xf32>
    tpu.vector_store %arg4[%c0_7, %c0_8, %c0_9], %10 {strides = array<i32>} : memref<1x16x128xf32, #tpu.memory_space<vmem>>, vector<1x16x128xf32>,
    return
  }
  func.func @transform_0(%arg0: i32) -> (i32, i32) {
    %c0_i32 = arith.constant 0 : i32
    %c0_i32_0 = arith.constant 0 : i32
    %c0_i32_1 = arith.constant 0 : i32
    return %c0_i32, %c0_i32_0 : i32, i32
  }
  func.func @transform_1(%arg0: i32) -> (i32, i32, i32) {
    %c0_i32 = arith.constant 0 : i32
    %c0_i32_0 = arith.constant 0 : i32
    %c0_i32_1 = arith.constant 0 : i32
    return %arg0, %c0_i32, %c0_i32_0 : i32, i32, i32
  }
  func.func @transform_2(%arg0: i32) -> (i32, i32, i32) {
    %c0_i32 = arith.constant 0 : i32
    %c0_i32_0 = arith.constant 0 : i32
    %c0_i32_1 = arith.constant 0 : i32
    return %arg0, %c0_i32, %c0_i32_0 : i32, i32, i32
  }
  func.func @transform_3(%arg0: i32) -> (i32, i32, i32) {
    %c0_i32 = arith.constant 0 : i32
    %c0_i32_0 = arith.constant 0 : i32
    %c0_i32_1 = arith.constant 0 : i32
    return %arg0, %c0_i32, %c0_i32_0 : i32, i32, i32
  }
}

module attributes {stable_mosaic.version = 11 : i64} {
  func.func @_lstm_seq_kernel(%arg0: i32, %arg1: memref<1x8x2x128xf32, #tpu.memory_space<vmem>>, %arg2: memref<1x32x128xf32, #tpu.memory_space<vmem>>, %arg3: memref<1x8x2x32xf32, #tpu.memory_space<vmem>>) attributes {dimension_semantics = [#tpu.dimension_semantics<parallel>], iteration_bounds = array<i64: 2>, scalar_prefetch = 0 : i64, scratch_operands = 0 : i64, tpu.core_type = #tpu.core_type<tc>, window_params = [{transform_indices = @transform_0, window_bounds = array<i64: 1, 8, 2, 128>}, {transform_indices = @transform_1, window_bounds = array<i64: 1, 32, 128>}, {transform_indices = @transform_2, window_bounds = array<i64: 1, 8, 2, 32>}]} {
    %c0 = arith.constant 0 : index
    %c0_0 = arith.constant 0 : index
    %c0_1 = arith.constant 0 : index
    %0 = vector.load %arg2[%c0, %c0_0, %c0_1] : memref<1x32x128xf32, #tpu.memory_space<vmem>>, vector<1x32x128xf32>
    %1 = vector.shape_cast %0 : vector<1x32x128xf32> to vector<32x128xf32>
    %cst = arith.constant 0.000000e+00 : f32
    %2 = vector.broadcast %cst : f32 to vector<2x32xf32>
    %cst_2 = arith.constant 0.000000e+00 : f32
    %3 = vector.broadcast %cst_2 : f32 to vector<2x32xf32>
    %c0_i32 = arith.constant 0 : i32
    %c0_i32_3 = arith.constant 0 : i32
    %4 = arith.cmpi eq, %arg0, %c0_i32_3 : i32
    %c7_i32 = arith.constant 7 : i32
    %5 = arith.subi %c7_i32, %c0_i32 : i32
    %6 = arith.select %4, %c0_i32, %5 : i32
    %c0_4 = arith.constant 0 : index
    %7 = arith.index_cast %6 : i32 to index
    %c0_5 = arith.constant 0 : index
    %c0_6 = arith.constant 0 : index
    %8 = vector.load %arg1[%c0_4, %7, %c0_5, %c0_6] : memref<1x8x2x128xf32, #tpu.memory_space<vmem>>, vector<1x1x2x128xf32>
    %9 = vector.shape_cast %8 : vector<1x1x2x128xf32> to vector<2x128xf32>
    %cst_7 = arith.constant dense<0.000000e+00> : vector<2x128xf32>
    %10 = tpu.matmul %2, %1, %cst_7 {dimension_numbers = #tpu.dot_dimension_numbers<[1], [0], [0], [1], [0, 0, 1, 1], [], []>} : vector<2x32xf32>, vector<32x128xf32>, vector<2x128xf32> -> vector<2x128xf32>
    %11 = arith.addf %9, %10 : vector<2x128xf32>
    %12 = vector.extract_strided_slice %11 {offsets = [0, 0], sizes = [2, 32], strides = [1, 1]} : vector<2x128xf32> to vector<2x32xf32>
    %13 = arith.negf %12 : vector<2x32xf32>
    %14 = math.exp %13 : vector<2x32xf32>
    %cst_8 = arith.constant 1.000000e+00 : f32
    %15 = vector.broadcast %cst_8 : f32 to vector<2x32xf32>
    %16 = arith.addf %15, %14 : vector<2x32xf32>
    %17 = arith.divf %15, %16 : vector<2x32xf32>
    %18 = vector.extract_strided_slice %11 {offsets = [0, 32], sizes = [2, 32], strides = [1, 1]} : vector<2x128xf32> to vector<2x32xf32>
    %19 = arith.negf %18 : vector<2x32xf32>
    %20 = math.exp %19 : vector<2x32xf32>
    %cst_9 = arith.constant 1.000000e+00 : f32
    %21 = vector.broadcast %cst_9 : f32 to vector<2x32xf32>
    %22 = arith.addf %21, %20 : vector<2x32xf32>
    %23 = arith.divf %21, %22 : vector<2x32xf32>
    %24 = vector.extract_strided_slice %11 {offsets = [0, 64], sizes = [2, 32], strides = [1, 1]} : vector<2x128xf32> to vector<2x32xf32>
    %25 = math.tanh %24 : vector<2x32xf32>
    %26 = vector.extract_strided_slice %11 {offsets = [0, 96], sizes = [2, 32], strides = [1, 1]} : vector<2x128xf32> to vector<2x32xf32>
    %27 = arith.negf %26 : vector<2x32xf32>
    %28 = math.exp %27 : vector<2x32xf32>
    %cst_10 = arith.constant 1.000000e+00 : f32
    %29 = vector.broadcast %cst_10 : f32 to vector<2x32xf32>
    %30 = arith.addf %29, %28 : vector<2x32xf32>
    %31 = arith.divf %29, %30 : vector<2x32xf32>
    %32 = arith.mulf %23, %3 : vector<2x32xf32>
    %33 = arith.mulf %17, %25 : vector<2x32xf32>
    %34 = arith.addf %32, %33 : vector<2x32xf32>
    %35 = math.tanh %34 : vector<2x32xf32>
    %36 = arith.mulf %31, %35 : vector<2x32xf32>
    %c0_11 = arith.constant 0 : index
    %37 = arith.index_cast %6 : i32 to index
    %c0_12 = arith.constant 0 : index
    %c0_13 = arith.constant 0 : index
    %38 = vector.load %arg3[%c0_11, %37, %c0_12, %c0_13] : memref<1x8x2x32xf32, #tpu.memory_space<vmem>>, vector<1x1x2x32xf32>
    %39 = vector.shape_cast %38 : vector<1x1x2x32xf32> to vector<2x32xf32>
    %40 = vector.shape_cast %36 : vector<2x32xf32> to vector<1x1x2x32xf32>
    tpu.vector_store %arg3[%c0_11, %37, %c0_12, %c0_13], %40 {strides = array<i32>} : memref<1x8x2x32xf32, #tpu.memory_space<vmem>>, vector<1x1x2x32xf32>,
    %c1_i32 = arith.constant 1 : i32
    %c0_i32_14 = arith.constant 0 : i32
    %41 = arith.cmpi eq, %arg0, %c0_i32_14 : i32
    %c7_i32_15 = arith.constant 7 : i32
    %42 = arith.subi %c7_i32_15, %c1_i32 : i32
    %43 = arith.select %41, %c1_i32, %42 : i32
    %c0_16 = arith.constant 0 : index
    %44 = arith.index_cast %43 : i32 to index
    %c0_17 = arith.constant 0 : index
    %c0_18 = arith.constant 0 : index
    %45 = vector.load %arg1[%c0_16, %44, %c0_17, %c0_18] : memref<1x8x2x128xf32, #tpu.memory_space<vmem>>, vector<1x1x2x128xf32>
    %46 = vector.shape_cast %45 : vector<1x1x2x128xf32> to vector<2x128xf32>
    %cst_19 = arith.constant dense<0.000000e+00> : vector<2x128xf32>
    %47 = tpu.matmul %36, %1, %cst_19 {dimension_numbers = #tpu.dot_dimension_numbers<[1], [0], [0], [1], [0, 0, 1, 1], [], []>} : vector<2x32xf32>, vector<32x128xf32>, vector<2x128xf32> -> vector<2x128xf32>
    %48 = arith.addf %46, %47 : vector<2x128xf32>
    %49 = vector.extract_strided_slice %48 {offsets = [0, 0], sizes = [2, 32], strides = [1, 1]} : vector<2x128xf32> to vector<2x32xf32>
    %50 = arith.negf %49 : vector<2x32xf32>
    %51 = math.exp %50 : vector<2x32xf32>
    %cst_20 = arith.constant 1.000000e+00 : f32
    %52 = vector.broadcast %cst_20 : f32 to vector<2x32xf32>
    %53 = arith.addf %52, %51 : vector<2x32xf32>
    %54 = arith.divf %52, %53 : vector<2x32xf32>
    %55 = vector.extract_strided_slice %48 {offsets = [0, 32], sizes = [2, 32], strides = [1, 1]} : vector<2x128xf32> to vector<2x32xf32>
    %56 = arith.negf %55 : vector<2x32xf32>
    %57 = math.exp %56 : vector<2x32xf32>
    %cst_21 = arith.constant 1.000000e+00 : f32
    %58 = vector.broadcast %cst_21 : f32 to vector<2x32xf32>
    %59 = arith.addf %58, %57 : vector<2x32xf32>
    %60 = arith.divf %58, %59 : vector<2x32xf32>
    %61 = vector.extract_strided_slice %48 {offsets = [0, 64], sizes = [2, 32], strides = [1, 1]} : vector<2x128xf32> to vector<2x32xf32>
    %62 = math.tanh %61 : vector<2x32xf32>
    %63 = vector.extract_strided_slice %48 {offsets = [0, 96], sizes = [2, 32], strides = [1, 1]} : vector<2x128xf32> to vector<2x32xf32>
    %64 = arith.negf %63 : vector<2x32xf32>
    %65 = math.exp %64 : vector<2x32xf32>
    %cst_22 = arith.constant 1.000000e+00 : f32
    %66 = vector.broadcast %cst_22 : f32 to vector<2x32xf32>
    %67 = arith.addf %66, %65 : vector<2x32xf32>
    %68 = arith.divf %66, %67 : vector<2x32xf32>
    %69 = arith.mulf %60, %34 : vector<2x32xf32>
    %70 = arith.mulf %54, %62 : vector<2x32xf32>
    %71 = arith.addf %69, %70 : vector<2x32xf32>
    %72 = math.tanh %71 : vector<2x32xf32>
    %73 = arith.mulf %68, %72 : vector<2x32xf32>
    %c0_23 = arith.constant 0 : index
    %74 = arith.index_cast %43 : i32 to index
    %c0_24 = arith.constant 0 : index
    %c0_25 = arith.constant 0 : index
    %75 = vector.load %arg3[%c0_23, %74, %c0_24, %c0_25] : memref<1x8x2x32xf32, #tpu.memory_space<vmem>>, vector<1x1x2x32xf32>
    %76 = vector.shape_cast %75 : vector<1x1x2x32xf32> to vector<2x32xf32>
    %77 = vector.shape_cast %73 : vector<2x32xf32> to vector<1x1x2x32xf32>
    tpu.vector_store %arg3[%c0_23, %74, %c0_24, %c0_25], %77 {strides = array<i32>} : memref<1x8x2x32xf32, #tpu.memory_space<vmem>>, vector<1x1x2x32xf32>,
    %c2_i32 = arith.constant 2 : i32
    %c0_i32_26 = arith.constant 0 : i32
    %78 = arith.cmpi eq, %arg0, %c0_i32_26 : i32
    %c7_i32_27 = arith.constant 7 : i32
    %79 = arith.subi %c7_i32_27, %c2_i32 : i32
    %80 = arith.select %78, %c2_i32, %79 : i32
    %c0_28 = arith.constant 0 : index
    %81 = arith.index_cast %80 : i32 to index
    %c0_29 = arith.constant 0 : index
    %c0_30 = arith.constant 0 : index
    %82 = vector.load %arg1[%c0_28, %81, %c0_29, %c0_30] : memref<1x8x2x128xf32, #tpu.memory_space<vmem>>, vector<1x1x2x128xf32>
    %83 = vector.shape_cast %82 : vector<1x1x2x128xf32> to vector<2x128xf32>
    %cst_31 = arith.constant dense<0.000000e+00> : vector<2x128xf32>
    %84 = tpu.matmul %73, %1, %cst_31 {dimension_numbers = #tpu.dot_dimension_numbers<[1], [0], [0], [1], [0, 0, 1, 1], [], []>} : vector<2x32xf32>, vector<32x128xf32>, vector<2x128xf32> -> vector<2x128xf32>
    %85 = arith.addf %83, %84 : vector<2x128xf32>
    %86 = vector.extract_strided_slice %85 {offsets = [0, 0], sizes = [2, 32], strides = [1, 1]} : vector<2x128xf32> to vector<2x32xf32>
    %87 = arith.negf %86 : vector<2x32xf32>
    %88 = math.exp %87 : vector<2x32xf32>
    %cst_32 = arith.constant 1.000000e+00 : f32
    %89 = vector.broadcast %cst_32 : f32 to vector<2x32xf32>
    %90 = arith.addf %89, %88 : vector<2x32xf32>
    %91 = arith.divf %89, %90 : vector<2x32xf32>
    %92 = vector.extract_strided_slice %85 {offsets = [0, 32], sizes = [2, 32], strides = [1, 1]} : vector<2x128xf32> to vector<2x32xf32>
    %93 = arith.negf %92 : vector<2x32xf32>
    %94 = math.exp %93 : vector<2x32xf32>
    %cst_33 = arith.constant 1.000000e+00 : f32
    %95 = vector.broadcast %cst_33 : f32 to vector<2x32xf32>
    %96 = arith.addf %95, %94 : vector<2x32xf32>
    %97 = arith.divf %95, %96 : vector<2x32xf32>
    %98 = vector.extract_strided_slice %85 {offsets = [0, 64], sizes = [2, 32], strides = [1, 1]} : vector<2x128xf32> to vector<2x32xf32>
    %99 = math.tanh %98 : vector<2x32xf32>
    %100 = vector.extract_strided_slice %85 {offsets = [0, 96], sizes = [2, 32], strides = [1, 1]} : vector<2x128xf32> to vector<2x32xf32>
    %101 = arith.negf %100 : vector<2x32xf32>
    %102 = math.exp %101 : vector<2x32xf32>
    %cst_34 = arith.constant 1.000000e+00 : f32
    %103 = vector.broadcast %cst_34 : f32 to vector<2x32xf32>
    %104 = arith.addf %103, %102 : vector<2x32xf32>
    %105 = arith.divf %103, %104 : vector<2x32xf32>
    %106 = arith.mulf %97, %71 : vector<2x32xf32>
    %107 = arith.mulf %91, %99 : vector<2x32xf32>
    %108 = arith.addf %106, %107 : vector<2x32xf32>
    %109 = math.tanh %108 : vector<2x32xf32>
    %110 = arith.mulf %105, %109 : vector<2x32xf32>
    %c0_35 = arith.constant 0 : index
    %111 = arith.index_cast %80 : i32 to index
    %c0_36 = arith.constant 0 : index
    %c0_37 = arith.constant 0 : index
    %112 = vector.load %arg3[%c0_35, %111, %c0_36, %c0_37] : memref<1x8x2x32xf32, #tpu.memory_space<vmem>>, vector<1x1x2x32xf32>
    %113 = vector.shape_cast %112 : vector<1x1x2x32xf32> to vector<2x32xf32>
    %114 = vector.shape_cast %110 : vector<2x32xf32> to vector<1x1x2x32xf32>
    tpu.vector_store %arg3[%c0_35, %111, %c0_36, %c0_37], %114 {strides = array<i32>} : memref<1x8x2x32xf32, #tpu.memory_space<vmem>>, vector<1x1x2x32xf32>,
    %c3_i32 = arith.constant 3 : i32
    %c0_i32_38 = arith.constant 0 : i32
    %115 = arith.cmpi eq, %arg0, %c0_i32_38 : i32
    %c7_i32_39 = arith.constant 7 : i32
    %116 = arith.subi %c7_i32_39, %c3_i32 : i32
    %117 = arith.select %115, %c3_i32, %116 : i32
    %c0_40 = arith.constant 0 : index
    %118 = arith.index_cast %117 : i32 to index
    %c0_41 = arith.constant 0 : index
    %c0_42 = arith.constant 0 : index
    %119 = vector.load %arg1[%c0_40, %118, %c0_41, %c0_42] : memref<1x8x2x128xf32, #tpu.memory_space<vmem>>, vector<1x1x2x128xf32>
    %120 = vector.shape_cast %119 : vector<1x1x2x128xf32> to vector<2x128xf32>
    %cst_43 = arith.constant dense<0.000000e+00> : vector<2x128xf32>
    %121 = tpu.matmul %110, %1, %cst_43 {dimension_numbers = #tpu.dot_dimension_numbers<[1], [0], [0], [1], [0, 0, 1, 1], [], []>} : vector<2x32xf32>, vector<32x128xf32>, vector<2x128xf32> -> vector<2x128xf32>
    %122 = arith.addf %120, %121 : vector<2x128xf32>
    %123 = vector.extract_strided_slice %122 {offsets = [0, 0], sizes = [2, 32], strides = [1, 1]} : vector<2x128xf32> to vector<2x32xf32>
    %124 = arith.negf %123 : vector<2x32xf32>
    %125 = math.exp %124 : vector<2x32xf32>
    %cst_44 = arith.constant 1.000000e+00 : f32
    %126 = vector.broadcast %cst_44 : f32 to vector<2x32xf32>
    %127 = arith.addf %126, %125 : vector<2x32xf32>
    %128 = arith.divf %126, %127 : vector<2x32xf32>
    %129 = vector.extract_strided_slice %122 {offsets = [0, 32], sizes = [2, 32], strides = [1, 1]} : vector<2x128xf32> to vector<2x32xf32>
    %130 = arith.negf %129 : vector<2x32xf32>
    %131 = math.exp %130 : vector<2x32xf32>
    %cst_45 = arith.constant 1.000000e+00 : f32
    %132 = vector.broadcast %cst_45 : f32 to vector<2x32xf32>
    %133 = arith.addf %132, %131 : vector<2x32xf32>
    %134 = arith.divf %132, %133 : vector<2x32xf32>
    %135 = vector.extract_strided_slice %122 {offsets = [0, 64], sizes = [2, 32], strides = [1, 1]} : vector<2x128xf32> to vector<2x32xf32>
    %136 = math.tanh %135 : vector<2x32xf32>
    %137 = vector.extract_strided_slice %122 {offsets = [0, 96], sizes = [2, 32], strides = [1, 1]} : vector<2x128xf32> to vector<2x32xf32>
    %138 = arith.negf %137 : vector<2x32xf32>
    %139 = math.exp %138 : vector<2x32xf32>
    %cst_46 = arith.constant 1.000000e+00 : f32
    %140 = vector.broadcast %cst_46 : f32 to vector<2x32xf32>
    %141 = arith.addf %140, %139 : vector<2x32xf32>
    %142 = arith.divf %140, %141 : vector<2x32xf32>
    %143 = arith.mulf %134, %108 : vector<2x32xf32>
    %144 = arith.mulf %128, %136 : vector<2x32xf32>
    %145 = arith.addf %143, %144 : vector<2x32xf32>
    %146 = math.tanh %145 : vector<2x32xf32>
    %147 = arith.mulf %142, %146 : vector<2x32xf32>
    %c0_47 = arith.constant 0 : index
    %148 = arith.index_cast %117 : i32 to index
    %c0_48 = arith.constant 0 : index
    %c0_49 = arith.constant 0 : index
    %149 = vector.load %arg3[%c0_47, %148, %c0_48, %c0_49] : memref<1x8x2x32xf32, #tpu.memory_space<vmem>>, vector<1x1x2x32xf32>
    %150 = vector.shape_cast %149 : vector<1x1x2x32xf32> to vector<2x32xf32>
    %151 = vector.shape_cast %147 : vector<2x32xf32> to vector<1x1x2x32xf32>
    tpu.vector_store %arg3[%c0_47, %148, %c0_48, %c0_49], %151 {strides = array<i32>} : memref<1x8x2x32xf32, #tpu.memory_space<vmem>>, vector<1x1x2x32xf32>,
    %c4_i32 = arith.constant 4 : i32
    %c0_i32_50 = arith.constant 0 : i32
    %152 = arith.cmpi eq, %arg0, %c0_i32_50 : i32
    %c7_i32_51 = arith.constant 7 : i32
    %153 = arith.subi %c7_i32_51, %c4_i32 : i32
    %154 = arith.select %152, %c4_i32, %153 : i32
    %c0_52 = arith.constant 0 : index
    %155 = arith.index_cast %154 : i32 to index
    %c0_53 = arith.constant 0 : index
    %c0_54 = arith.constant 0 : index
    %156 = vector.load %arg1[%c0_52, %155, %c0_53, %c0_54] : memref<1x8x2x128xf32, #tpu.memory_space<vmem>>, vector<1x1x2x128xf32>
    %157 = vector.shape_cast %156 : vector<1x1x2x128xf32> to vector<2x128xf32>
    %cst_55 = arith.constant dense<0.000000e+00> : vector<2x128xf32>
    %158 = tpu.matmul %147, %1, %cst_55 {dimension_numbers = #tpu.dot_dimension_numbers<[1], [0], [0], [1], [0, 0, 1, 1], [], []>} : vector<2x32xf32>, vector<32x128xf32>, vector<2x128xf32> -> vector<2x128xf32>
    %159 = arith.addf %157, %158 : vector<2x128xf32>
    %160 = vector.extract_strided_slice %159 {offsets = [0, 0], sizes = [2, 32], strides = [1, 1]} : vector<2x128xf32> to vector<2x32xf32>
    %161 = arith.negf %160 : vector<2x32xf32>
    %162 = math.exp %161 : vector<2x32xf32>
    %cst_56 = arith.constant 1.000000e+00 : f32
    %163 = vector.broadcast %cst_56 : f32 to vector<2x32xf32>
    %164 = arith.addf %163, %162 : vector<2x32xf32>
    %165 = arith.divf %163, %164 : vector<2x32xf32>
    %166 = vector.extract_strided_slice %159 {offsets = [0, 32], sizes = [2, 32], strides = [1, 1]} : vector<2x128xf32> to vector<2x32xf32>
    %167 = arith.negf %166 : vector<2x32xf32>
    %168 = math.exp %167 : vector<2x32xf32>
    %cst_57 = arith.constant 1.000000e+00 : f32
    %169 = vector.broadcast %cst_57 : f32 to vector<2x32xf32>
    %170 = arith.addf %169, %168 : vector<2x32xf32>
    %171 = arith.divf %169, %170 : vector<2x32xf32>
    %172 = vector.extract_strided_slice %159 {offsets = [0, 64], sizes = [2, 32], strides = [1, 1]} : vector<2x128xf32> to vector<2x32xf32>
    %173 = math.tanh %172 : vector<2x32xf32>
    %174 = vector.extract_strided_slice %159 {offsets = [0, 96], sizes = [2, 32], strides = [1, 1]} : vector<2x128xf32> to vector<2x32xf32>
    %175 = arith.negf %174 : vector<2x32xf32>
    %176 = math.exp %175 : vector<2x32xf32>
    %cst_58 = arith.constant 1.000000e+00 : f32
    %177 = vector.broadcast %cst_58 : f32 to vector<2x32xf32>
    %178 = arith.addf %177, %176 : vector<2x32xf32>
    %179 = arith.divf %177, %178 : vector<2x32xf32>
    %180 = arith.mulf %171, %145 : vector<2x32xf32>
    %181 = arith.mulf %165, %173 : vector<2x32xf32>
    %182 = arith.addf %180, %181 : vector<2x32xf32>
    %183 = math.tanh %182 : vector<2x32xf32>
    %184 = arith.mulf %179, %183 : vector<2x32xf32>
    %c0_59 = arith.constant 0 : index
    %185 = arith.index_cast %154 : i32 to index
    %c0_60 = arith.constant 0 : index
    %c0_61 = arith.constant 0 : index
    %186 = vector.load %arg3[%c0_59, %185, %c0_60, %c0_61] : memref<1x8x2x32xf32, #tpu.memory_space<vmem>>, vector<1x1x2x32xf32>
    %187 = vector.shape_cast %186 : vector<1x1x2x32xf32> to vector<2x32xf32>
    %188 = vector.shape_cast %184 : vector<2x32xf32> to vector<1x1x2x32xf32>
    tpu.vector_store %arg3[%c0_59, %185, %c0_60, %c0_61], %188 {strides = array<i32>} : memref<1x8x2x32xf32, #tpu.memory_space<vmem>>, vector<1x1x2x32xf32>,
    %c5_i32 = arith.constant 5 : i32
    %c0_i32_62 = arith.constant 0 : i32
    %189 = arith.cmpi eq, %arg0, %c0_i32_62 : i32
    %c7_i32_63 = arith.constant 7 : i32
    %190 = arith.subi %c7_i32_63, %c5_i32 : i32
    %191 = arith.select %189, %c5_i32, %190 : i32
    %c0_64 = arith.constant 0 : index
    %192 = arith.index_cast %191 : i32 to index
    %c0_65 = arith.constant 0 : index
    %c0_66 = arith.constant 0 : index
    %193 = vector.load %arg1[%c0_64, %192, %c0_65, %c0_66] : memref<1x8x2x128xf32, #tpu.memory_space<vmem>>, vector<1x1x2x128xf32>
    %194 = vector.shape_cast %193 : vector<1x1x2x128xf32> to vector<2x128xf32>
    %cst_67 = arith.constant dense<0.000000e+00> : vector<2x128xf32>
    %195 = tpu.matmul %184, %1, %cst_67 {dimension_numbers = #tpu.dot_dimension_numbers<[1], [0], [0], [1], [0, 0, 1, 1], [], []>} : vector<2x32xf32>, vector<32x128xf32>, vector<2x128xf32> -> vector<2x128xf32>
    %196 = arith.addf %194, %195 : vector<2x128xf32>
    %197 = vector.extract_strided_slice %196 {offsets = [0, 0], sizes = [2, 32], strides = [1, 1]} : vector<2x128xf32> to vector<2x32xf32>
    %198 = arith.negf %197 : vector<2x32xf32>
    %199 = math.exp %198 : vector<2x32xf32>
    %cst_68 = arith.constant 1.000000e+00 : f32
    %200 = vector.broadcast %cst_68 : f32 to vector<2x32xf32>
    %201 = arith.addf %200, %199 : vector<2x32xf32>
    %202 = arith.divf %200, %201 : vector<2x32xf32>
    %203 = vector.extract_strided_slice %196 {offsets = [0, 32], sizes = [2, 32], strides = [1, 1]} : vector<2x128xf32> to vector<2x32xf32>
    %204 = arith.negf %203 : vector<2x32xf32>
    %205 = math.exp %204 : vector<2x32xf32>
    %cst_69 = arith.constant 1.000000e+00 : f32
    %206 = vector.broadcast %cst_69 : f32 to vector<2x32xf32>
    %207 = arith.addf %206, %205 : vector<2x32xf32>
    %208 = arith.divf %206, %207 : vector<2x32xf32>
    %209 = vector.extract_strided_slice %196 {offsets = [0, 64], sizes = [2, 32], strides = [1, 1]} : vector<2x128xf32> to vector<2x32xf32>
    %210 = math.tanh %209 : vector<2x32xf32>
    %211 = vector.extract_strided_slice %196 {offsets = [0, 96], sizes = [2, 32], strides = [1, 1]} : vector<2x128xf32> to vector<2x32xf32>
    %212 = arith.negf %211 : vector<2x32xf32>
    %213 = math.exp %212 : vector<2x32xf32>
    %cst_70 = arith.constant 1.000000e+00 : f32
    %214 = vector.broadcast %cst_70 : f32 to vector<2x32xf32>
    %215 = arith.addf %214, %213 : vector<2x32xf32>
    %216 = arith.divf %214, %215 : vector<2x32xf32>
    %217 = arith.mulf %208, %182 : vector<2x32xf32>
    %218 = arith.mulf %202, %210 : vector<2x32xf32>
    %219 = arith.addf %217, %218 : vector<2x32xf32>
    %220 = math.tanh %219 : vector<2x32xf32>
    %221 = arith.mulf %216, %220 : vector<2x32xf32>
    %c0_71 = arith.constant 0 : index
    %222 = arith.index_cast %191 : i32 to index
    %c0_72 = arith.constant 0 : index
    %c0_73 = arith.constant 0 : index
    %223 = vector.load %arg3[%c0_71, %222, %c0_72, %c0_73] : memref<1x8x2x32xf32, #tpu.memory_space<vmem>>, vector<1x1x2x32xf32>
    %224 = vector.shape_cast %223 : vector<1x1x2x32xf32> to vector<2x32xf32>
    %225 = vector.shape_cast %221 : vector<2x32xf32> to vector<1x1x2x32xf32>
    tpu.vector_store %arg3[%c0_71, %222, %c0_72, %c0_73], %225 {strides = array<i32>} : memref<1x8x2x32xf32, #tpu.memory_space<vmem>>, vector<1x1x2x32xf32>,
    %c6_i32 = arith.constant 6 : i32
    %c0_i32_74 = arith.constant 0 : i32
    %226 = arith.cmpi eq, %arg0, %c0_i32_74 : i32
    %c7_i32_75 = arith.constant 7 : i32
    %227 = arith.subi %c7_i32_75, %c6_i32 : i32
    %228 = arith.select %226, %c6_i32, %227 : i32
    %c0_76 = arith.constant 0 : index
    %229 = arith.index_cast %228 : i32 to index
    %c0_77 = arith.constant 0 : index
    %c0_78 = arith.constant 0 : index
    %230 = vector.load %arg1[%c0_76, %229, %c0_77, %c0_78] : memref<1x8x2x128xf32, #tpu.memory_space<vmem>>, vector<1x1x2x128xf32>
    %231 = vector.shape_cast %230 : vector<1x1x2x128xf32> to vector<2x128xf32>
    %cst_79 = arith.constant dense<0.000000e+00> : vector<2x128xf32>
    %232 = tpu.matmul %221, %1, %cst_79 {dimension_numbers = #tpu.dot_dimension_numbers<[1], [0], [0], [1], [0, 0, 1, 1], [], []>} : vector<2x32xf32>, vector<32x128xf32>, vector<2x128xf32> -> vector<2x128xf32>
    %233 = arith.addf %231, %232 : vector<2x128xf32>
    %234 = vector.extract_strided_slice %233 {offsets = [0, 0], sizes = [2, 32], strides = [1, 1]} : vector<2x128xf32> to vector<2x32xf32>
    %235 = arith.negf %234 : vector<2x32xf32>
    %236 = math.exp %235 : vector<2x32xf32>
    %cst_80 = arith.constant 1.000000e+00 : f32
    %237 = vector.broadcast %cst_80 : f32 to vector<2x32xf32>
    %238 = arith.addf %237, %236 : vector<2x32xf32>
    %239 = arith.divf %237, %238 : vector<2x32xf32>
    %240 = vector.extract_strided_slice %233 {offsets = [0, 32], sizes = [2, 32], strides = [1, 1]} : vector<2x128xf32> to vector<2x32xf32>
    %241 = arith.negf %240 : vector<2x32xf32>
    %242 = math.exp %241 : vector<2x32xf32>
    %cst_81 = arith.constant 1.000000e+00 : f32
    %243 = vector.broadcast %cst_81 : f32 to vector<2x32xf32>
    %244 = arith.addf %243, %242 : vector<2x32xf32>
    %245 = arith.divf %243, %244 : vector<2x32xf32>
    %246 = vector.extract_strided_slice %233 {offsets = [0, 64], sizes = [2, 32], strides = [1, 1]} : vector<2x128xf32> to vector<2x32xf32>
    %247 = math.tanh %246 : vector<2x32xf32>
    %248 = vector.extract_strided_slice %233 {offsets = [0, 96], sizes = [2, 32], strides = [1, 1]} : vector<2x128xf32> to vector<2x32xf32>
    %249 = arith.negf %248 : vector<2x32xf32>
    %250 = math.exp %249 : vector<2x32xf32>
    %cst_82 = arith.constant 1.000000e+00 : f32
    %251 = vector.broadcast %cst_82 : f32 to vector<2x32xf32>
    %252 = arith.addf %251, %250 : vector<2x32xf32>
    %253 = arith.divf %251, %252 : vector<2x32xf32>
    %254 = arith.mulf %245, %219 : vector<2x32xf32>
    %255 = arith.mulf %239, %247 : vector<2x32xf32>
    %256 = arith.addf %254, %255 : vector<2x32xf32>
    %257 = math.tanh %256 : vector<2x32xf32>
    %258 = arith.mulf %253, %257 : vector<2x32xf32>
    %c0_83 = arith.constant 0 : index
    %259 = arith.index_cast %228 : i32 to index
    %c0_84 = arith.constant 0 : index
    %c0_85 = arith.constant 0 : index
    %260 = vector.load %arg3[%c0_83, %259, %c0_84, %c0_85] : memref<1x8x2x32xf32, #tpu.memory_space<vmem>>, vector<1x1x2x32xf32>
    %261 = vector.shape_cast %260 : vector<1x1x2x32xf32> to vector<2x32xf32>
    %262 = vector.shape_cast %258 : vector<2x32xf32> to vector<1x1x2x32xf32>
    tpu.vector_store %arg3[%c0_83, %259, %c0_84, %c0_85], %262 {strides = array<i32>} : memref<1x8x2x32xf32, #tpu.memory_space<vmem>>, vector<1x1x2x32xf32>,
    %c7_i32_86 = arith.constant 7 : i32
    %c0_i32_87 = arith.constant 0 : i32
    %263 = arith.cmpi eq, %arg0, %c0_i32_87 : i32
    %c7_i32_88 = arith.constant 7 : i32
    %264 = arith.subi %c7_i32_88, %c7_i32_86 : i32
    %265 = arith.select %263, %c7_i32_86, %264 : i32
    %c0_89 = arith.constant 0 : index
    %266 = arith.index_cast %265 : i32 to index
    %c0_90 = arith.constant 0 : index
    %c0_91 = arith.constant 0 : index
    %267 = vector.load %arg1[%c0_89, %266, %c0_90, %c0_91] : memref<1x8x2x128xf32, #tpu.memory_space<vmem>>, vector<1x1x2x128xf32>
    %268 = vector.shape_cast %267 : vector<1x1x2x128xf32> to vector<2x128xf32>
    %cst_92 = arith.constant dense<0.000000e+00> : vector<2x128xf32>
    %269 = tpu.matmul %258, %1, %cst_92 {dimension_numbers = #tpu.dot_dimension_numbers<[1], [0], [0], [1], [0, 0, 1, 1], [], []>} : vector<2x32xf32>, vector<32x128xf32>, vector<2x128xf32> -> vector<2x128xf32>
    %270 = arith.addf %268, %269 : vector<2x128xf32>
    %271 = vector.extract_strided_slice %270 {offsets = [0, 0], sizes = [2, 32], strides = [1, 1]} : vector<2x128xf32> to vector<2x32xf32>
    %272 = arith.negf %271 : vector<2x32xf32>
    %273 = math.exp %272 : vector<2x32xf32>
    %cst_93 = arith.constant 1.000000e+00 : f32
    %274 = vector.broadcast %cst_93 : f32 to vector<2x32xf32>
    %275 = arith.addf %274, %273 : vector<2x32xf32>
    %276 = arith.divf %274, %275 : vector<2x32xf32>
    %277 = vector.extract_strided_slice %270 {offsets = [0, 32], sizes = [2, 32], strides = [1, 1]} : vector<2x128xf32> to vector<2x32xf32>
    %278 = arith.negf %277 : vector<2x32xf32>
    %279 = math.exp %278 : vector<2x32xf32>
    %cst_94 = arith.constant 1.000000e+00 : f32
    %280 = vector.broadcast %cst_94 : f32 to vector<2x32xf32>
    %281 = arith.addf %280, %279 : vector<2x32xf32>
    %282 = arith.divf %280, %281 : vector<2x32xf32>
    %283 = vector.extract_strided_slice %270 {offsets = [0, 64], sizes = [2, 32], strides = [1, 1]} : vector<2x128xf32> to vector<2x32xf32>
    %284 = math.tanh %283 : vector<2x32xf32>
    %285 = vector.extract_strided_slice %270 {offsets = [0, 96], sizes = [2, 32], strides = [1, 1]} : vector<2x128xf32> to vector<2x32xf32>
    %286 = arith.negf %285 : vector<2x32xf32>
    %287 = math.exp %286 : vector<2x32xf32>
    %cst_95 = arith.constant 1.000000e+00 : f32
    %288 = vector.broadcast %cst_95 : f32 to vector<2x32xf32>
    %289 = arith.addf %288, %287 : vector<2x32xf32>
    %290 = arith.divf %288, %289 : vector<2x32xf32>
    %291 = arith.mulf %282, %256 : vector<2x32xf32>
    %292 = arith.mulf %276, %284 : vector<2x32xf32>
    %293 = arith.addf %291, %292 : vector<2x32xf32>
    %294 = math.tanh %293 : vector<2x32xf32>
    %295 = arith.mulf %290, %294 : vector<2x32xf32>
    %c0_96 = arith.constant 0 : index
    %296 = arith.index_cast %265 : i32 to index
    %c0_97 = arith.constant 0 : index
    %c0_98 = arith.constant 0 : index
    %297 = vector.load %arg3[%c0_96, %296, %c0_97, %c0_98] : memref<1x8x2x32xf32, #tpu.memory_space<vmem>>, vector<1x1x2x32xf32>
    %298 = vector.shape_cast %297 : vector<1x1x2x32xf32> to vector<2x32xf32>
    %299 = vector.shape_cast %295 : vector<2x32xf32> to vector<1x1x2x32xf32>
    tpu.vector_store %arg3[%c0_96, %296, %c0_97, %c0_98], %299 {strides = array<i32>} : memref<1x8x2x32xf32, #tpu.memory_space<vmem>>, vector<1x1x2x32xf32>,
    %c8_i32 = arith.constant 8 : i32
    return
  }
  func.func @transform_0(%arg0: i32) -> (i32, i32, i32, i32) {
    %c0_i32 = arith.constant 0 : i32
    %c0_i32_0 = arith.constant 0 : i32
    %c0_i32_1 = arith.constant 0 : i32
    %c0_i32_2 = arith.constant 0 : i32
    return %arg0, %c0_i32, %c0_i32_0, %c0_i32_1 : i32, i32, i32, i32
  }
  func.func @transform_1(%arg0: i32) -> (i32, i32, i32) {
    %c0_i32 = arith.constant 0 : i32
    %c0_i32_0 = arith.constant 0 : i32
    %c0_i32_1 = arith.constant 0 : i32
    return %arg0, %c0_i32, %c0_i32_0 : i32, i32, i32
  }
  func.func @transform_2(%arg0: i32) -> (i32, i32, i32, i32) {
    %c0_i32 = arith.constant 0 : i32
    %c0_i32_0 = arith.constant 0 : i32
    %c0_i32_1 = arith.constant 0 : i32
    %c0_i32_2 = arith.constant 0 : i32
    return %arg0, %c0_i32, %c0_i32_0, %c0_i32_1 : i32, i32, i32, i32
  }
}

module attributes {stable_mosaic.version = 11 : i64} {
  func.func @_lstm_last_kernel(%arg0: i32, %arg1: memref<1x8x2x128xf32, #tpu.memory_space<vmem>>, %arg2: memref<1x32x128xf32, #tpu.memory_space<vmem>>, %arg3: memref<1x2x32xf32, #tpu.memory_space<vmem>>) attributes {dimension_semantics = [#tpu.dimension_semantics<parallel>], iteration_bounds = array<i64: 2>, scalar_prefetch = 0 : i64, scratch_operands = 0 : i64, tpu.core_type = #tpu.core_type<tc>, window_params = [{transform_indices = @transform_0, window_bounds = array<i64: 1, 8, 2, 128>}, {transform_indices = @transform_1, window_bounds = array<i64: 1, 32, 128>}, {transform_indices = @transform_2, window_bounds = array<i64: 1, 2, 32>}]} {
    %c0 = arith.constant 0 : index
    %c0_0 = arith.constant 0 : index
    %c0_1 = arith.constant 0 : index
    %0 = vector.load %arg2[%c0, %c0_0, %c0_1] : memref<1x32x128xf32, #tpu.memory_space<vmem>>, vector<1x32x128xf32>
    %1 = vector.shape_cast %0 : vector<1x32x128xf32> to vector<32x128xf32>
    %cst = arith.constant 0.000000e+00 : f32
    %2 = vector.broadcast %cst : f32 to vector<2x32xf32>
    %cst_2 = arith.constant 0.000000e+00 : f32
    %3 = vector.broadcast %cst_2 : f32 to vector<2x32xf32>
    %c0_i32 = arith.constant 0 : i32
    %c0_i32_3 = arith.constant 0 : i32
    %4 = arith.cmpi eq, %arg0, %c0_i32_3 : i32
    %c7_i32 = arith.constant 7 : i32
    %5 = arith.subi %c7_i32, %c0_i32 : i32
    %6 = arith.select %4, %c0_i32, %5 : i32
    %c0_4 = arith.constant 0 : index
    %7 = arith.index_cast %6 : i32 to index
    %c0_5 = arith.constant 0 : index
    %c0_6 = arith.constant 0 : index
    %8 = vector.load %arg1[%c0_4, %7, %c0_5, %c0_6] : memref<1x8x2x128xf32, #tpu.memory_space<vmem>>, vector<1x1x2x128xf32>
    %9 = vector.shape_cast %8 : vector<1x1x2x128xf32> to vector<2x128xf32>
    %cst_7 = arith.constant dense<0.000000e+00> : vector<2x128xf32>
    %10 = tpu.matmul %2, %1, %cst_7 {dimension_numbers = #tpu.dot_dimension_numbers<[1], [0], [0], [1], [0, 0, 1, 1], [], []>} : vector<2x32xf32>, vector<32x128xf32>, vector<2x128xf32> -> vector<2x128xf32>
    %11 = arith.addf %9, %10 : vector<2x128xf32>
    %12 = vector.extract_strided_slice %11 {offsets = [0, 0], sizes = [2, 32], strides = [1, 1]} : vector<2x128xf32> to vector<2x32xf32>
    %13 = arith.negf %12 : vector<2x32xf32>
    %14 = math.exp %13 : vector<2x32xf32>
    %cst_8 = arith.constant 1.000000e+00 : f32
    %15 = vector.broadcast %cst_8 : f32 to vector<2x32xf32>
    %16 = arith.addf %15, %14 : vector<2x32xf32>
    %17 = arith.divf %15, %16 : vector<2x32xf32>
    %18 = vector.extract_strided_slice %11 {offsets = [0, 32], sizes = [2, 32], strides = [1, 1]} : vector<2x128xf32> to vector<2x32xf32>
    %19 = arith.negf %18 : vector<2x32xf32>
    %20 = math.exp %19 : vector<2x32xf32>
    %cst_9 = arith.constant 1.000000e+00 : f32
    %21 = vector.broadcast %cst_9 : f32 to vector<2x32xf32>
    %22 = arith.addf %21, %20 : vector<2x32xf32>
    %23 = arith.divf %21, %22 : vector<2x32xf32>
    %24 = vector.extract_strided_slice %11 {offsets = [0, 64], sizes = [2, 32], strides = [1, 1]} : vector<2x128xf32> to vector<2x32xf32>
    %25 = math.tanh %24 : vector<2x32xf32>
    %26 = vector.extract_strided_slice %11 {offsets = [0, 96], sizes = [2, 32], strides = [1, 1]} : vector<2x128xf32> to vector<2x32xf32>
    %27 = arith.negf %26 : vector<2x32xf32>
    %28 = math.exp %27 : vector<2x32xf32>
    %cst_10 = arith.constant 1.000000e+00 : f32
    %29 = vector.broadcast %cst_10 : f32 to vector<2x32xf32>
    %30 = arith.addf %29, %28 : vector<2x32xf32>
    %31 = arith.divf %29, %30 : vector<2x32xf32>
    %32 = arith.mulf %23, %3 : vector<2x32xf32>
    %33 = arith.mulf %17, %25 : vector<2x32xf32>
    %34 = arith.addf %32, %33 : vector<2x32xf32>
    %35 = math.tanh %34 : vector<2x32xf32>
    %36 = arith.mulf %31, %35 : vector<2x32xf32>
    %c1_i32 = arith.constant 1 : i32
    %c0_i32_11 = arith.constant 0 : i32
    %37 = arith.cmpi eq, %arg0, %c0_i32_11 : i32
    %c7_i32_12 = arith.constant 7 : i32
    %38 = arith.subi %c7_i32_12, %c1_i32 : i32
    %39 = arith.select %37, %c1_i32, %38 : i32
    %c0_13 = arith.constant 0 : index
    %40 = arith.index_cast %39 : i32 to index
    %c0_14 = arith.constant 0 : index
    %c0_15 = arith.constant 0 : index
    %41 = vector.load %arg1[%c0_13, %40, %c0_14, %c0_15] : memref<1x8x2x128xf32, #tpu.memory_space<vmem>>, vector<1x1x2x128xf32>
    %42 = vector.shape_cast %41 : vector<1x1x2x128xf32> to vector<2x128xf32>
    %cst_16 = arith.constant dense<0.000000e+00> : vector<2x128xf32>
    %43 = tpu.matmul %36, %1, %cst_16 {dimension_numbers = #tpu.dot_dimension_numbers<[1], [0], [0], [1], [0, 0, 1, 1], [], []>} : vector<2x32xf32>, vector<32x128xf32>, vector<2x128xf32> -> vector<2x128xf32>
    %44 = arith.addf %42, %43 : vector<2x128xf32>
    %45 = vector.extract_strided_slice %44 {offsets = [0, 0], sizes = [2, 32], strides = [1, 1]} : vector<2x128xf32> to vector<2x32xf32>
    %46 = arith.negf %45 : vector<2x32xf32>
    %47 = math.exp %46 : vector<2x32xf32>
    %cst_17 = arith.constant 1.000000e+00 : f32
    %48 = vector.broadcast %cst_17 : f32 to vector<2x32xf32>
    %49 = arith.addf %48, %47 : vector<2x32xf32>
    %50 = arith.divf %48, %49 : vector<2x32xf32>
    %51 = vector.extract_strided_slice %44 {offsets = [0, 32], sizes = [2, 32], strides = [1, 1]} : vector<2x128xf32> to vector<2x32xf32>
    %52 = arith.negf %51 : vector<2x32xf32>
    %53 = math.exp %52 : vector<2x32xf32>
    %cst_18 = arith.constant 1.000000e+00 : f32
    %54 = vector.broadcast %cst_18 : f32 to vector<2x32xf32>
    %55 = arith.addf %54, %53 : vector<2x32xf32>
    %56 = arith.divf %54, %55 : vector<2x32xf32>
    %57 = vector.extract_strided_slice %44 {offsets = [0, 64], sizes = [2, 32], strides = [1, 1]} : vector<2x128xf32> to vector<2x32xf32>
    %58 = math.tanh %57 : vector<2x32xf32>
    %59 = vector.extract_strided_slice %44 {offsets = [0, 96], sizes = [2, 32], strides = [1, 1]} : vector<2x128xf32> to vector<2x32xf32>
    %60 = arith.negf %59 : vector<2x32xf32>
    %61 = math.exp %60 : vector<2x32xf32>
    %cst_19 = arith.constant 1.000000e+00 : f32
    %62 = vector.broadcast %cst_19 : f32 to vector<2x32xf32>
    %63 = arith.addf %62, %61 : vector<2x32xf32>
    %64 = arith.divf %62, %63 : vector<2x32xf32>
    %65 = arith.mulf %56, %34 : vector<2x32xf32>
    %66 = arith.mulf %50, %58 : vector<2x32xf32>
    %67 = arith.addf %65, %66 : vector<2x32xf32>
    %68 = math.tanh %67 : vector<2x32xf32>
    %69 = arith.mulf %64, %68 : vector<2x32xf32>
    %c2_i32 = arith.constant 2 : i32
    %c0_i32_20 = arith.constant 0 : i32
    %70 = arith.cmpi eq, %arg0, %c0_i32_20 : i32
    %c7_i32_21 = arith.constant 7 : i32
    %71 = arith.subi %c7_i32_21, %c2_i32 : i32
    %72 = arith.select %70, %c2_i32, %71 : i32
    %c0_22 = arith.constant 0 : index
    %73 = arith.index_cast %72 : i32 to index
    %c0_23 = arith.constant 0 : index
    %c0_24 = arith.constant 0 : index
    %74 = vector.load %arg1[%c0_22, %73, %c0_23, %c0_24] : memref<1x8x2x128xf32, #tpu.memory_space<vmem>>, vector<1x1x2x128xf32>
    %75 = vector.shape_cast %74 : vector<1x1x2x128xf32> to vector<2x128xf32>
    %cst_25 = arith.constant dense<0.000000e+00> : vector<2x128xf32>
    %76 = tpu.matmul %69, %1, %cst_25 {dimension_numbers = #tpu.dot_dimension_numbers<[1], [0], [0], [1], [0, 0, 1, 1], [], []>} : vector<2x32xf32>, vector<32x128xf32>, vector<2x128xf32> -> vector<2x128xf32>
    %77 = arith.addf %75, %76 : vector<2x128xf32>
    %78 = vector.extract_strided_slice %77 {offsets = [0, 0], sizes = [2, 32], strides = [1, 1]} : vector<2x128xf32> to vector<2x32xf32>
    %79 = arith.negf %78 : vector<2x32xf32>
    %80 = math.exp %79 : vector<2x32xf32>
    %cst_26 = arith.constant 1.000000e+00 : f32
    %81 = vector.broadcast %cst_26 : f32 to vector<2x32xf32>
    %82 = arith.addf %81, %80 : vector<2x32xf32>
    %83 = arith.divf %81, %82 : vector<2x32xf32>
    %84 = vector.extract_strided_slice %77 {offsets = [0, 32], sizes = [2, 32], strides = [1, 1]} : vector<2x128xf32> to vector<2x32xf32>
    %85 = arith.negf %84 : vector<2x32xf32>
    %86 = math.exp %85 : vector<2x32xf32>
    %cst_27 = arith.constant 1.000000e+00 : f32
    %87 = vector.broadcast %cst_27 : f32 to vector<2x32xf32>
    %88 = arith.addf %87, %86 : vector<2x32xf32>
    %89 = arith.divf %87, %88 : vector<2x32xf32>
    %90 = vector.extract_strided_slice %77 {offsets = [0, 64], sizes = [2, 32], strides = [1, 1]} : vector<2x128xf32> to vector<2x32xf32>
    %91 = math.tanh %90 : vector<2x32xf32>
    %92 = vector.extract_strided_slice %77 {offsets = [0, 96], sizes = [2, 32], strides = [1, 1]} : vector<2x128xf32> to vector<2x32xf32>
    %93 = arith.negf %92 : vector<2x32xf32>
    %94 = math.exp %93 : vector<2x32xf32>
    %cst_28 = arith.constant 1.000000e+00 : f32
    %95 = vector.broadcast %cst_28 : f32 to vector<2x32xf32>
    %96 = arith.addf %95, %94 : vector<2x32xf32>
    %97 = arith.divf %95, %96 : vector<2x32xf32>
    %98 = arith.mulf %89, %67 : vector<2x32xf32>
    %99 = arith.mulf %83, %91 : vector<2x32xf32>
    %100 = arith.addf %98, %99 : vector<2x32xf32>
    %101 = math.tanh %100 : vector<2x32xf32>
    %102 = arith.mulf %97, %101 : vector<2x32xf32>
    %c3_i32 = arith.constant 3 : i32
    %c0_i32_29 = arith.constant 0 : i32
    %103 = arith.cmpi eq, %arg0, %c0_i32_29 : i32
    %c7_i32_30 = arith.constant 7 : i32
    %104 = arith.subi %c7_i32_30, %c3_i32 : i32
    %105 = arith.select %103, %c3_i32, %104 : i32
    %c0_31 = arith.constant 0 : index
    %106 = arith.index_cast %105 : i32 to index
    %c0_32 = arith.constant 0 : index
    %c0_33 = arith.constant 0 : index
    %107 = vector.load %arg1[%c0_31, %106, %c0_32, %c0_33] : memref<1x8x2x128xf32, #tpu.memory_space<vmem>>, vector<1x1x2x128xf32>
    %108 = vector.shape_cast %107 : vector<1x1x2x128xf32> to vector<2x128xf32>
    %cst_34 = arith.constant dense<0.000000e+00> : vector<2x128xf32>
    %109 = tpu.matmul %102, %1, %cst_34 {dimension_numbers = #tpu.dot_dimension_numbers<[1], [0], [0], [1], [0, 0, 1, 1], [], []>} : vector<2x32xf32>, vector<32x128xf32>, vector<2x128xf32> -> vector<2x128xf32>
    %110 = arith.addf %108, %109 : vector<2x128xf32>
    %111 = vector.extract_strided_slice %110 {offsets = [0, 0], sizes = [2, 32], strides = [1, 1]} : vector<2x128xf32> to vector<2x32xf32>
    %112 = arith.negf %111 : vector<2x32xf32>
    %113 = math.exp %112 : vector<2x32xf32>
    %cst_35 = arith.constant 1.000000e+00 : f32
    %114 = vector.broadcast %cst_35 : f32 to vector<2x32xf32>
    %115 = arith.addf %114, %113 : vector<2x32xf32>
    %116 = arith.divf %114, %115 : vector<2x32xf32>
    %117 = vector.extract_strided_slice %110 {offsets = [0, 32], sizes = [2, 32], strides = [1, 1]} : vector<2x128xf32> to vector<2x32xf32>
    %118 = arith.negf %117 : vector<2x32xf32>
    %119 = math.exp %118 : vector<2x32xf32>
    %cst_36 = arith.constant 1.000000e+00 : f32
    %120 = vector.broadcast %cst_36 : f32 to vector<2x32xf32>
    %121 = arith.addf %120, %119 : vector<2x32xf32>
    %122 = arith.divf %120, %121 : vector<2x32xf32>
    %123 = vector.extract_strided_slice %110 {offsets = [0, 64], sizes = [2, 32], strides = [1, 1]} : vector<2x128xf32> to vector<2x32xf32>
    %124 = math.tanh %123 : vector<2x32xf32>
    %125 = vector.extract_strided_slice %110 {offsets = [0, 96], sizes = [2, 32], strides = [1, 1]} : vector<2x128xf32> to vector<2x32xf32>
    %126 = arith.negf %125 : vector<2x32xf32>
    %127 = math.exp %126 : vector<2x32xf32>
    %cst_37 = arith.constant 1.000000e+00 : f32
    %128 = vector.broadcast %cst_37 : f32 to vector<2x32xf32>
    %129 = arith.addf %128, %127 : vector<2x32xf32>
    %130 = arith.divf %128, %129 : vector<2x32xf32>
    %131 = arith.mulf %122, %100 : vector<2x32xf32>
    %132 = arith.mulf %116, %124 : vector<2x32xf32>
    %133 = arith.addf %131, %132 : vector<2x32xf32>
    %134 = math.tanh %133 : vector<2x32xf32>
    %135 = arith.mulf %130, %134 : vector<2x32xf32>
    %c4_i32 = arith.constant 4 : i32
    %c0_i32_38 = arith.constant 0 : i32
    %136 = arith.cmpi eq, %arg0, %c0_i32_38 : i32
    %c7_i32_39 = arith.constant 7 : i32
    %137 = arith.subi %c7_i32_39, %c4_i32 : i32
    %138 = arith.select %136, %c4_i32, %137 : i32
    %c0_40 = arith.constant 0 : index
    %139 = arith.index_cast %138 : i32 to index
    %c0_41 = arith.constant 0 : index
    %c0_42 = arith.constant 0 : index
    %140 = vector.load %arg1[%c0_40, %139, %c0_41, %c0_42] : memref<1x8x2x128xf32, #tpu.memory_space<vmem>>, vector<1x1x2x128xf32>
    %141 = vector.shape_cast %140 : vector<1x1x2x128xf32> to vector<2x128xf32>
    %cst_43 = arith.constant dense<0.000000e+00> : vector<2x128xf32>
    %142 = tpu.matmul %135, %1, %cst_43 {dimension_numbers = #tpu.dot_dimension_numbers<[1], [0], [0], [1], [0, 0, 1, 1], [], []>} : vector<2x32xf32>, vector<32x128xf32>, vector<2x128xf32> -> vector<2x128xf32>
    %143 = arith.addf %141, %142 : vector<2x128xf32>
    %144 = vector.extract_strided_slice %143 {offsets = [0, 0], sizes = [2, 32], strides = [1, 1]} : vector<2x128xf32> to vector<2x32xf32>
    %145 = arith.negf %144 : vector<2x32xf32>
    %146 = math.exp %145 : vector<2x32xf32>
    %cst_44 = arith.constant 1.000000e+00 : f32
    %147 = vector.broadcast %cst_44 : f32 to vector<2x32xf32>
    %148 = arith.addf %147, %146 : vector<2x32xf32>
    %149 = arith.divf %147, %148 : vector<2x32xf32>
    %150 = vector.extract_strided_slice %143 {offsets = [0, 32], sizes = [2, 32], strides = [1, 1]} : vector<2x128xf32> to vector<2x32xf32>
    %151 = arith.negf %150 : vector<2x32xf32>
    %152 = math.exp %151 : vector<2x32xf32>
    %cst_45 = arith.constant 1.000000e+00 : f32
    %153 = vector.broadcast %cst_45 : f32 to vector<2x32xf32>
    %154 = arith.addf %153, %152 : vector<2x32xf32>
    %155 = arith.divf %153, %154 : vector<2x32xf32>
    %156 = vector.extract_strided_slice %143 {offsets = [0, 64], sizes = [2, 32], strides = [1, 1]} : vector<2x128xf32> to vector<2x32xf32>
    %157 = math.tanh %156 : vector<2x32xf32>
    %158 = vector.extract_strided_slice %143 {offsets = [0, 96], sizes = [2, 32], strides = [1, 1]} : vector<2x128xf32> to vector<2x32xf32>
    %159 = arith.negf %158 : vector<2x32xf32>
    %160 = math.exp %159 : vector<2x32xf32>
    %cst_46 = arith.constant 1.000000e+00 : f32
    %161 = vector.broadcast %cst_46 : f32 to vector<2x32xf32>
    %162 = arith.addf %161, %160 : vector<2x32xf32>
    %163 = arith.divf %161, %162 : vector<2x32xf32>
    %164 = arith.mulf %155, %133 : vector<2x32xf32>
    %165 = arith.mulf %149, %157 : vector<2x32xf32>
    %166 = arith.addf %164, %165 : vector<2x32xf32>
    %167 = math.tanh %166 : vector<2x32xf32>
    %168 = arith.mulf %163, %167 : vector<2x32xf32>
    %c5_i32 = arith.constant 5 : i32
    %c0_i32_47 = arith.constant 0 : i32
    %169 = arith.cmpi eq, %arg0, %c0_i32_47 : i32
    %c7_i32_48 = arith.constant 7 : i32
    %170 = arith.subi %c7_i32_48, %c5_i32 : i32
    %171 = arith.select %169, %c5_i32, %170 : i32
    %c0_49 = arith.constant 0 : index
    %172 = arith.index_cast %171 : i32 to index
    %c0_50 = arith.constant 0 : index
    %c0_51 = arith.constant 0 : index
    %173 = vector.load %arg1[%c0_49, %172, %c0_50, %c0_51] : memref<1x8x2x128xf32, #tpu.memory_space<vmem>>, vector<1x1x2x128xf32>
    %174 = vector.shape_cast %173 : vector<1x1x2x128xf32> to vector<2x128xf32>
    %cst_52 = arith.constant dense<0.000000e+00> : vector<2x128xf32>
    %175 = tpu.matmul %168, %1, %cst_52 {dimension_numbers = #tpu.dot_dimension_numbers<[1], [0], [0], [1], [0, 0, 1, 1], [], []>} : vector<2x32xf32>, vector<32x128xf32>, vector<2x128xf32> -> vector<2x128xf32>
    %176 = arith.addf %174, %175 : vector<2x128xf32>
    %177 = vector.extract_strided_slice %176 {offsets = [0, 0], sizes = [2, 32], strides = [1, 1]} : vector<2x128xf32> to vector<2x32xf32>
    %178 = arith.negf %177 : vector<2x32xf32>
    %179 = math.exp %178 : vector<2x32xf32>
    %cst_53 = arith.constant 1.000000e+00 : f32
    %180 = vector.broadcast %cst_53 : f32 to vector<2x32xf32>
    %181 = arith.addf %180, %179 : vector<2x32xf32>
    %182 = arith.divf %180, %181 : vector<2x32xf32>
    %183 = vector.extract_strided_slice %176 {offsets = [0, 32], sizes = [2, 32], strides = [1, 1]} : vector<2x128xf32> to vector<2x32xf32>
    %184 = arith.negf %183 : vector<2x32xf32>
    %185 = math.exp %184 : vector<2x32xf32>
    %cst_54 = arith.constant 1.000000e+00 : f32
    %186 = vector.broadcast %cst_54 : f32 to vector<2x32xf32>
    %187 = arith.addf %186, %185 : vector<2x32xf32>
    %188 = arith.divf %186, %187 : vector<2x32xf32>
    %189 = vector.extract_strided_slice %176 {offsets = [0, 64], sizes = [2, 32], strides = [1, 1]} : vector<2x128xf32> to vector<2x32xf32>
    %190 = math.tanh %189 : vector<2x32xf32>
    %191 = vector.extract_strided_slice %176 {offsets = [0, 96], sizes = [2, 32], strides = [1, 1]} : vector<2x128xf32> to vector<2x32xf32>
    %192 = arith.negf %191 : vector<2x32xf32>
    %193 = math.exp %192 : vector<2x32xf32>
    %cst_55 = arith.constant 1.000000e+00 : f32
    %194 = vector.broadcast %cst_55 : f32 to vector<2x32xf32>
    %195 = arith.addf %194, %193 : vector<2x32xf32>
    %196 = arith.divf %194, %195 : vector<2x32xf32>
    %197 = arith.mulf %188, %166 : vector<2x32xf32>
    %198 = arith.mulf %182, %190 : vector<2x32xf32>
    %199 = arith.addf %197, %198 : vector<2x32xf32>
    %200 = math.tanh %199 : vector<2x32xf32>
    %201 = arith.mulf %196, %200 : vector<2x32xf32>
    %c6_i32 = arith.constant 6 : i32
    %c0_i32_56 = arith.constant 0 : i32
    %202 = arith.cmpi eq, %arg0, %c0_i32_56 : i32
    %c7_i32_57 = arith.constant 7 : i32
    %203 = arith.subi %c7_i32_57, %c6_i32 : i32
    %204 = arith.select %202, %c6_i32, %203 : i32
    %c0_58 = arith.constant 0 : index
    %205 = arith.index_cast %204 : i32 to index
    %c0_59 = arith.constant 0 : index
    %c0_60 = arith.constant 0 : index
    %206 = vector.load %arg1[%c0_58, %205, %c0_59, %c0_60] : memref<1x8x2x128xf32, #tpu.memory_space<vmem>>, vector<1x1x2x128xf32>
    %207 = vector.shape_cast %206 : vector<1x1x2x128xf32> to vector<2x128xf32>
    %cst_61 = arith.constant dense<0.000000e+00> : vector<2x128xf32>
    %208 = tpu.matmul %201, %1, %cst_61 {dimension_numbers = #tpu.dot_dimension_numbers<[1], [0], [0], [1], [0, 0, 1, 1], [], []>} : vector<2x32xf32>, vector<32x128xf32>, vector<2x128xf32> -> vector<2x128xf32>
    %209 = arith.addf %207, %208 : vector<2x128xf32>
    %210 = vector.extract_strided_slice %209 {offsets = [0, 0], sizes = [2, 32], strides = [1, 1]} : vector<2x128xf32> to vector<2x32xf32>
    %211 = arith.negf %210 : vector<2x32xf32>
    %212 = math.exp %211 : vector<2x32xf32>
    %cst_62 = arith.constant 1.000000e+00 : f32
    %213 = vector.broadcast %cst_62 : f32 to vector<2x32xf32>
    %214 = arith.addf %213, %212 : vector<2x32xf32>
    %215 = arith.divf %213, %214 : vector<2x32xf32>
    %216 = vector.extract_strided_slice %209 {offsets = [0, 32], sizes = [2, 32], strides = [1, 1]} : vector<2x128xf32> to vector<2x32xf32>
    %217 = arith.negf %216 : vector<2x32xf32>
    %218 = math.exp %217 : vector<2x32xf32>
    %cst_63 = arith.constant 1.000000e+00 : f32
    %219 = vector.broadcast %cst_63 : f32 to vector<2x32xf32>
    %220 = arith.addf %219, %218 : vector<2x32xf32>
    %221 = arith.divf %219, %220 : vector<2x32xf32>
    %222 = vector.extract_strided_slice %209 {offsets = [0, 64], sizes = [2, 32], strides = [1, 1]} : vector<2x128xf32> to vector<2x32xf32>
    %223 = math.tanh %222 : vector<2x32xf32>
    %224 = vector.extract_strided_slice %209 {offsets = [0, 96], sizes = [2, 32], strides = [1, 1]} : vector<2x128xf32> to vector<2x32xf32>
    %225 = arith.negf %224 : vector<2x32xf32>
    %226 = math.exp %225 : vector<2x32xf32>
    %cst_64 = arith.constant 1.000000e+00 : f32
    %227 = vector.broadcast %cst_64 : f32 to vector<2x32xf32>
    %228 = arith.addf %227, %226 : vector<2x32xf32>
    %229 = arith.divf %227, %228 : vector<2x32xf32>
    %230 = arith.mulf %221, %199 : vector<2x32xf32>
    %231 = arith.mulf %215, %223 : vector<2x32xf32>
    %232 = arith.addf %230, %231 : vector<2x32xf32>
    %233 = math.tanh %232 : vector<2x32xf32>
    %234 = arith.mulf %229, %233 : vector<2x32xf32>
    %c7_i32_65 = arith.constant 7 : i32
    %c0_i32_66 = arith.constant 0 : i32
    %235 = arith.cmpi eq, %arg0, %c0_i32_66 : i32
    %c7_i32_67 = arith.constant 7 : i32
    %236 = arith.subi %c7_i32_67, %c7_i32_65 : i32
    %237 = arith.select %235, %c7_i32_65, %236 : i32
    %c0_68 = arith.constant 0 : index
    %238 = arith.index_cast %237 : i32 to index
    %c0_69 = arith.constant 0 : index
    %c0_70 = arith.constant 0 : index
    %239 = vector.load %arg1[%c0_68, %238, %c0_69, %c0_70] : memref<1x8x2x128xf32, #tpu.memory_space<vmem>>, vector<1x1x2x128xf32>
    %240 = vector.shape_cast %239 : vector<1x1x2x128xf32> to vector<2x128xf32>
    %cst_71 = arith.constant dense<0.000000e+00> : vector<2x128xf32>
    %241 = tpu.matmul %234, %1, %cst_71 {dimension_numbers = #tpu.dot_dimension_numbers<[1], [0], [0], [1], [0, 0, 1, 1], [], []>} : vector<2x32xf32>, vector<32x128xf32>, vector<2x128xf32> -> vector<2x128xf32>
    %242 = arith.addf %240, %241 : vector<2x128xf32>
    %243 = vector.extract_strided_slice %242 {offsets = [0, 0], sizes = [2, 32], strides = [1, 1]} : vector<2x128xf32> to vector<2x32xf32>
    %244 = arith.negf %243 : vector<2x32xf32>
    %245 = math.exp %244 : vector<2x32xf32>
    %cst_72 = arith.constant 1.000000e+00 : f32
    %246 = vector.broadcast %cst_72 : f32 to vector<2x32xf32>
    %247 = arith.addf %246, %245 : vector<2x32xf32>
    %248 = arith.divf %246, %247 : vector<2x32xf32>
    %249 = vector.extract_strided_slice %242 {offsets = [0, 32], sizes = [2, 32], strides = [1, 1]} : vector<2x128xf32> to vector<2x32xf32>
    %250 = arith.negf %249 : vector<2x32xf32>
    %251 = math.exp %250 : vector<2x32xf32>
    %cst_73 = arith.constant 1.000000e+00 : f32
    %252 = vector.broadcast %cst_73 : f32 to vector<2x32xf32>
    %253 = arith.addf %252, %251 : vector<2x32xf32>
    %254 = arith.divf %252, %253 : vector<2x32xf32>
    %255 = vector.extract_strided_slice %242 {offsets = [0, 64], sizes = [2, 32], strides = [1, 1]} : vector<2x128xf32> to vector<2x32xf32>
    %256 = math.tanh %255 : vector<2x32xf32>
    %257 = vector.extract_strided_slice %242 {offsets = [0, 96], sizes = [2, 32], strides = [1, 1]} : vector<2x128xf32> to vector<2x32xf32>
    %258 = arith.negf %257 : vector<2x32xf32>
    %259 = math.exp %258 : vector<2x32xf32>
    %cst_74 = arith.constant 1.000000e+00 : f32
    %260 = vector.broadcast %cst_74 : f32 to vector<2x32xf32>
    %261 = arith.addf %260, %259 : vector<2x32xf32>
    %262 = arith.divf %260, %261 : vector<2x32xf32>
    %263 = arith.mulf %254, %232 : vector<2x32xf32>
    %264 = arith.mulf %248, %256 : vector<2x32xf32>
    %265 = arith.addf %263, %264 : vector<2x32xf32>
    %266 = math.tanh %265 : vector<2x32xf32>
    %267 = arith.mulf %262, %266 : vector<2x32xf32>
    %c8_i32 = arith.constant 8 : i32
    %c0_75 = arith.constant 0 : index
    %c0_76 = arith.constant 0 : index
    %c0_77 = arith.constant 0 : index
    %268 = vector.load %arg3[%c0_75, %c0_76, %c0_77] : memref<1x2x32xf32, #tpu.memory_space<vmem>>, vector<1x2x32xf32>
    %269 = vector.shape_cast %268 : vector<1x2x32xf32> to vector<2x32xf32>
    %270 = vector.shape_cast %267 : vector<2x32xf32> to vector<1x2x32xf32>
    tpu.vector_store %arg3[%c0_75, %c0_76, %c0_77], %270 {strides = array<i32>} : memref<1x2x32xf32, #tpu.memory_space<vmem>>, vector<1x2x32xf32>,
    return
  }
  func.func @transform_0(%arg0: i32) -> (i32, i32, i32, i32) {
    %c0_i32 = arith.constant 0 : i32
    %c0_i32_0 = arith.constant 0 : i32
    %c0_i32_1 = arith.constant 0 : i32
    %c0_i32_2 = arith.constant 0 : i32
    return %arg0, %c0_i32, %c0_i32_0, %c0_i32_1 : i32, i32, i32, i32
  }
  func.func @transform_1(%arg0: i32) -> (i32, i32, i32) {
    %c0_i32 = arith.constant 0 : i32
    %c0_i32_0 = arith.constant 0 : i32
    %c0_i32_1 = arith.constant 0 : i32
    return %arg0, %c0_i32, %c0_i32_0 : i32, i32, i32
  }
  func.func @transform_2(%arg0: i32) -> (i32, i32, i32) {
    %c0_i32 = arith.constant 0 : i32
    %c0_i32_0 = arith.constant 0 : i32
    %c0_i32_1 = arith.constant 0 : i32
    return %arg0, %c0_i32, %c0_i32_0 : i32, i32, i32
  }
}

module attributes {stable_mosaic.version = 11 : i64} {
  func.func @_head_kernel(%arg0: memref<2x2x32xf32, #tpu.memory_space<vmem>>, %arg1: memref<2x32x1xf32, #tpu.memory_space<vmem>>, %arg2: memref<1x1xf32, #tpu.memory_space<vmem>>, %arg3: memref<2x1xf32, #tpu.memory_space<vmem>>) attributes {dimension_semantics = [], scalar_prefetch = 0 : i64, scratch_operands = 0 : i64, tpu.core_type = #tpu.core_type<tc>} {
    %c0 = arith.constant 0 : index
    %c0_0 = arith.constant 0 : index
    %c0_1 = arith.constant 0 : index
    %0 = vector.load %arg0[%c0, %c0_0, %c0_1] : memref<2x2x32xf32, #tpu.memory_space<vmem>>, vector<1x2x32xf32>
    %1 = vector.shape_cast %0 : vector<1x2x32xf32> to vector<2x32xf32>
    %c0_2 = arith.constant 0 : index
    %c0_3 = arith.constant 0 : index
    %c0_4 = arith.constant 0 : index
    %2 = vector.load %arg1[%c0_2, %c0_3, %c0_4] : memref<2x32x1xf32, #tpu.memory_space<vmem>>, vector<1x32x1xf32>
    %3 = vector.shape_cast %2 : vector<1x32x1xf32> to vector<32x1xf32>
    %cst = arith.constant dense<0.000000e+00> : vector<2x1xf32>
    %4 = tpu.matmul %1, %3, %cst {dimension_numbers = #tpu.dot_dimension_numbers<[1], [0], [0], [1], [0, 0, 1, 1], [], []>} : vector<2x32xf32>, vector<32x1xf32>, vector<2x1xf32> -> vector<2x1xf32>
    %c1 = arith.constant 1 : index
    %c0_5 = arith.constant 0 : index
    %c0_6 = arith.constant 0 : index
    %5 = vector.load %arg0[%c1, %c0_5, %c0_6] : memref<2x2x32xf32, #tpu.memory_space<vmem>>, vector<1x2x32xf32>
    %6 = vector.shape_cast %5 : vector<1x2x32xf32> to vector<2x32xf32>
    %c1_7 = arith.constant 1 : index
    %c0_8 = arith.constant 0 : index
    %c0_9 = arith.constant 0 : index
    %7 = vector.load %arg1[%c1_7, %c0_8, %c0_9] : memref<2x32x1xf32, #tpu.memory_space<vmem>>, vector<1x32x1xf32>
    %8 = vector.shape_cast %7 : vector<1x32x1xf32> to vector<32x1xf32>
    %cst_10 = arith.constant dense<0.000000e+00> : vector<2x1xf32>
    %9 = tpu.matmul %6, %8, %cst_10 {dimension_numbers = #tpu.dot_dimension_numbers<[1], [0], [0], [1], [0, 0, 1, 1], [], []>} : vector<2x32xf32>, vector<32x1xf32>, vector<2x1xf32> -> vector<2x1xf32>
    %10 = arith.addf %4, %9 : vector<2x1xf32>
    %c0_11 = arith.constant 0 : index
    %c0_12 = arith.constant 0 : index
    %11 = vector.load %arg2[%c0_11, %c0_12] : memref<1x1xf32, #tpu.memory_space<vmem>>, vector<1x1xf32>
    %12 = vector.broadcast %11 : vector<1x1xf32> to vector<2x1xf32>
    %13 = arith.addf %10, %12 : vector<2x1xf32>
    %c0_13 = arith.constant 0 : index
    %c0_14 = arith.constant 0 : index
    %14 = vector.load %arg3[%c0_13, %c0_14] : memref<2x1xf32, #tpu.memory_space<vmem>>, vector<2x1xf32>
    tpu.vector_store %arg3[%c0_13, %c0_14], %13 {strides = array<i32>} : memref<2x1xf32, #tpu.memory_space<vmem>>, vector<2x1xf32>,
    return
  }
}

</mosaic_0001>

<bundles_post_ra>
// kernel: lstm_model_forward.7
= control target key start
LH: loop header
LB: loop body
LE: loop exit
PB: predicated region body
PF: predicated region fallthrough
CT: control target
= control target key end

     0   :  { %s640_s18 = smov 0   ;;  %s684_s0 = inlined_call_operand.vmem [shape: f32[16,32], index: 0, kind: input, shape index: {}]   ;;  %s685_s1 = inlined_call_operand.vmem [shape: f32[16,32], index: 1, kind: input, shape index: {}]   ;;  %s686_s2 = inlined_call_operand.vmem [shape: f32[2,32,128], index: 2, kind: input, shape index: {}]   ;;  %s687_s3 = inlined_call_operand.vmem [shape: f32[2,32,128], index: 3, kind: input, shape index: {}]   ;;  %s688_s4 = inlined_call_operand.vmem [shape: f32[2,1,128], index: 4, kind: input, shape index: {}]   ;;  %s689_s5 = inlined_call_operand.vmem [shape: f32[2,16,128], index: 5, kind: output, shape index: {}]  }
   0x1 LB: > { %s521_s19 = sadd.s32 4294967295, %s608_s18   ;;  %p525_p0 = scmp.ge.s32.totalorder %s608_s18, 1  ;;  %s608_s18 = sphi %s640_s18, %s15_s18  }
   0x2   : > { %p205_p1 = scmp.lt.s32.totalorder %s608_s18, 3 }
   0x4   : > { %p206_p2 = pnand %p525_p0, %p205_p1 }
   0x5   : > { %p241_p3 = scmp.lt.s32.totalorder (!%p206_p2), %s521_s19, 1  ;;  %v265_v0 = vld [vmem:[%s685_s1] sm:$0xff] (!%p206_p2)  ;;  %vm271_vm0 = vcmask (!%p206_p2), 261120   ;;  %v266_v14 = vld [vmem:[%s685_s1 + $0x8] sm:$0xff] (!%p206_p2) }
   0x6   : > { %209 = sbr.rel (%p206_p2) target bundleno = 246 (0xf6), region = 40  ;;  %v259_v1 = vld [vmem:[%s684_s0] sm:$0xff] (!%p206_p2)  ;;  %562 = vmatprep.mubr.msk.f32.mxu1 (!%p206_p2), %vm271_vm0, %v265_v0  ;;  %v260_v15 = vld [vmem:[%s684_s0 + $0x8] sm:$0xff] (!%p206_p2) }
   0x7   : > { %573 = vmatprep.mubr.msk.f32.mxu0 (!%p206_p2), %vm271_vm0, %v259_v1 }
   0xd   : > { %s691_s19 = smov (!%p241_p3, %s521_s19), 1 }
   0xe   : > { %s539_s24 = sshll.u32 %s691_s19, 5  ;;  %s253_s12 = scalar_lea.vmem %s688_s4, %s691_s19 }
   0xf   : > { %s250_s27 = scalar_lea.vmem %s687_s3, %s539_s24  ;;  %s245_s30 = scalar_lea.vmem %s686_s2, %s539_s24  ;;  %v536_v18 = vld [vmem:[%s253_s12] ss:$0 sm:$0xff] }
  0x10   : > { %v267_v2 = vld [vmem:[%s250_s27] sm:$0xff]  ;;  %v268_v3 = vld [vmem:[%s250_s27 + $0x8] sm:$0xff]  ;;  %v269_v7 = vld [vmem:[%s250_s27 + $0x10] sm:$0xff]  ;;  %s541_s13 = sshll.u32 %s691_s19, 4 }
  0x11   : > { %v261_v4 = vld [vmem:[%s245_s30] sm:$0xff]  ;;  %v576_v5 = vpack.c.bf16 %v268_v3, %v267_v2  ;;  %v262_v6 = vld [vmem:[%s245_s30 + $0x8] sm:$0xff]  ;;  %v270_v8 = vld [vmem:[%s250_s27 + $0x18] sm:$0xff]  ;;  %s258_s16 = scalar_lea.vmem %s689_s5, %s541_s13 }
  0x12   : > { %v584_v9 = vpack.c.bf16 %v262_v6, %v261_v4  ;;  %v580_v10 = vpack.c.bf16 %v270_v8, %v269_v7  ;;  %v263_v11 = vld [vmem:[%s245_s30 + $0x10] sm:$0xff]  ;;  %v264_v12 = vld [vmem:[%s245_s30 + $0x18] sm:$0xff] }
  0x13   : > { %577 = vmatprep.subr.bf16.mxu1 %v576_v5  ;;  %v588_v13 = vpack.c.bf16 %v264_v12, %v263_v11 }
  0x14   : > { %585 = vmatprep.subr.bf16.mxu0 %v584_v9  ;;  %579 = vmatpush3.bf16.msra.mxu1 %v576_v5 }
  0x15   : > { %587 = vmatpush3.bf16.msra.mxu0 %v584_v9  ;;  %581 = vmatprep.subr.bf16.mxu1 %v580_v10 }
  0x16   : > { %589 = vmatprep.subr.bf16.mxu0 %v588_v13 }
  0x18   : > { %583 = vmatpush3.bf16.msra.mxu1 %v580_v10 }
  0x19   : > { %591 = vmatpush3.bf16.msra.mxu0 %v588_v13 }
  0x1b   : > { %563 = vmatmul.mubr.msk.f32.vlgmr.msra.gmra.mrb[0].mxu1 %vm271_vm0, %v266_v14 }
  0x1c   : > { %574 = vmatmul.mubr.msk.f32.vlgmr.msra.gmra.mrb[0].mxu0 %vm271_vm0, %v260_v15 }
  0xee   : > { %v564_v16 = vpop.f32.mrb[0].mxu1 }
  0xef   : > { %v575_v17 = vpop.f32.mrb[0].mxu0  ;;  %v344_v19 = vpop.f32.mrb[1].mxu1 }
  0xf0   : > { %v431_v20 = vadd.f32 %v575_v17, %v564_v16  ;;  %v425_v21 = vpop.f32.mrb[1].mxu0 }
  0xf1   : > { %v426_v22 = vadd.f32 %v425_v21, %v344_v19 }
  0xf2   : > { %v442_v23 = vadd.f32 %v536_v18, %v431_v20 }
  0xf3   : > { %v441_v24 = vadd.f32 %v536_v18, %v426_v22 }
  0xf4   : > { %444 = vst [vmem:[%s258_s16 + $0x8] sm:$0xff] %v442_v23 }
  0xf5   : > { %443 = vst [vmem:[%s258_s16] sm:$0xff] %v441_v24 }
  0xf6 PF: > { %s15_s18 = sadd.s32 1, %s608_s18  }
  0xf7   : > { %p12_p4 = scmp.ge.s32.totalorder %s15_s18, 4  }
  0xf9   :  { %14 = sbr.rel (!%p12_p4) target bundleno = 1 (0x1), region = 76 }

// kernel: lstm_model_forward.5
= control target key start
LH: loop header
LB: loop body
LE: loop exit
PB: predicated region body
PF: predicated region fallthrough
CT: control target
= control target key end

     0   :  { %s423_s12 = smov 0   ;;  %s451_s0 = inlined_call_operand.vmem [shape: f32[16,32], index: 0, kind: input, shape index: {}]   ;;  %s452_s1 = inlined_call_operand.vmem [shape: f32[2,32,128], index: 1, kind: input, shape index: {}]   ;;  %s453_s2 = inlined_call_operand.vmem [shape: f32[2,1,128], index: 2, kind: input, shape index: {}]   ;;  %s454_s3 = inlined_call_operand.vmem [shape: f32[2,16,128], index: 3, kind: output, shape index: {}]  }
   0x1 LB: > { %s346_s13 = sadd.s32 4294967295, %s401_s12   ;;  %p350_p0 = scmp.ge.s32.totalorder %s401_s12, 1  ;;  %s401_s12 = sphi %s423_s12, %s13_s12  }
   0x2   : > { %p145_p1 = scmp.lt.s32.totalorder %s401_s12, 3 }
   0x4   : > { %p146_p2 = pnand %p350_p0, %p145_p1 }
   0x5   : > { %p172_p3 = scmp.lt.s32.totalorder (!%p146_p2), %s346_s13, 1  ;;  %v185_v0 = vld [vmem:[%s451_s0] sm:$0xff] (!%p146_p2)  ;;  %vm198_vm0 = vcmask (!%p146_p2), 261120   ;;  %v186_v7 = vld [vmem:[%s451_s0 + $0x8] sm:$0xff] (!%p146_p2) }
   0x6   : > { %149 = sbr.rel (%p146_p2) target bundleno = 243 (0xf3), region = 32  ;;  %376 = vmatprep.mubr.msk.f32.mxu0 (!%p146_p2), %vm198_vm0, %v185_v0 }
   0xd   : > { %s456_s13 = smov (!%p172_p3, %s346_s13), 1 }
   0xe   : > { %s360_s16 = sshll.u32 %s456_s13, 5  ;;  %s179_s24 = scalar_lea.vmem %s453_s2, %s456_s13 }
   0xf   : > { %s176_s19 = scalar_lea.vmem %s452_s1, %s360_s16  ;;  %s361_s25 = sshll.u32 %s456_s13, 4  ;;  %v355_v8 = vld [vmem:[%s179_s24] ss:$0 sm:$0xff] }
  0x10   : > { %v187_v1 = vld [vmem:[%s176_s19] sm:$0xff]  ;;  %v188_v2 = vld [vmem:[%s176_s19 + $0x8] sm:$0xff]  ;;  %v189_v3 = vld [vmem:[%s176_s19 + $0x10] sm:$0xff]  ;;  %s184_s28 = scalar_lea.vmem %s454_s3, %s361_s25 }
  0x11   : > { %v379_v4 = vpack.c.bf16 %v188_v2, %v187_v1  ;;  %v190_v5 = vld [vmem:[%s176_s19 + $0x18] sm:$0xff] }
  0x12   : > { %v383_v6 = vpack.c.bf16 %v190_v5, %v189_v3 }
  0x13   : > { %380 = vmatprep.subr.bf16.mxu0 %v379_v4 }
  0x14   : > { %382 = vmatpush3.bf16.msra.mxu0 %v379_v4 }
  0x15   : > { %384 = vmatprep.subr.bf16.mxu0 %v383_v6 }
  0x18   : > { %386 = vmatpush3.bf16.msra.mxu0 %v383_v6 }
  0x1b   : > { %377 = vmatmul.mubr.msk.f32.vlgmr.msra.gmra.mrb[0].mxu0 %vm198_vm0, %v186_v7 }
  0xee   : > { %v378_v9 = vpop.f32.mrb[0].mxu0 }
  0xef   : > { %v277_v10 = vadd.f32 %v378_v9, %v355_v8  ;;  %v271_v11 = vpop.f32.mrb[1].mxu0 }
  0xf0   : > { %v272_v12 = vadd.f32 %v355_v8, %v271_v11 }
  0xf1   : > { %281 = vst [vmem:[%s184_s28 + $0x8] sm:$0xff] %v277_v10 }
  0xf2   : > { %280 = vst [vmem:[%s184_s28] sm:$0xff] %v272_v12 }
  0xf3 PF: > { %s13_s12 = sadd.s32 1, %s401_s12  }
  0xf4   : > { %p10_p4 = scmp.ge.s32.totalorder %s13_s12, 4  }
  0xf6   :  { %12 = sbr.rel (!%p10_p4) target bundleno = 1 (0x1), region = 65 }

// kernel: lstm_model_forward.6
= control target key start
LH: loop header
LB: loop body
LE: loop exit
PB: predicated region body
PF: predicated region fallthrough
CT: control target
= control target key end

     0   :  { %s1447_s9 = smov 0   ;;  %s1644_s0 = inlined_call_operand.vmem [shape: f32[2,8,2,128], index: 0, kind: input, shape index: {}]   ;;  %s1645_s1 = inlined_call_operand.vmem [shape: f32[2,32,128], index: 1, kind: input, shape index: {}]   ;;  %s1646_s2 = inlined_call_operand.vmem [shape: f32[2,8,2,32], index: 2, kind: output, shape index: {}]  }
   0x1 LB: > { %s1453_s10 = sadd.s32 4294967295, %s1425_s9   ;;  %p1131_p0 = scmp.ge.s32.totalorder %s1425_s9, 1  ;;  %s1425_s9 = sphi %s1447_s9, %s12_s9  }
   0x2   : > { %p122_p1 = scmp.lt.s32.totalorder %s1425_s9, 3 }
   0x4   : > { %p123_p2 = pnand %p1131_p0, %p122_p1 }
   0x5   : > { %p149_p3 = scmp.lt.s32.totalorder (!%p123_p2), %s1453_s10, 1  ;;  %v1427_v0 = vmov (!%p123_p2), 0.0|0.0   ;;  %vm1428_vm0 = vmmov (!%p123_p2), 0   ;;  %v1429_v1 = vmov (!%p123_p2), 0.0   ;;  %p168_p4 = scmp.eq.s32.totalorder (!%p123_p2), %s1453_s10, 0  ;;  %vm277_vm1 = vcmask (!%p123_p2), 254976  }
   0x6   : > { %126 = sbr.rel (%p123_p2) target bundleno = 5644 (0x160c), region = 28  ;;  %1294 = vmatprep.subr.bf16.mxu0 (!%p123_p2), %v1427_v0  ;;  %1214 = vmatprep.mubr.msk.f32.mxu0 (!%p123_p2), %vm1428_vm0, %v1429_v1  ;;  %s1430_s23 = smov (!%p123_p2), 64   ;;  %vm173_vm2 = vcmask (!%p123_p2), 261120  }
   0x7   : > { %1300 = vmatprep.subr.bf16.mxu1 (!%p123_p2), %v1427_v0  ;;  %1225 = vmatprep.mubr.msk.f32.mxu1 (!%p123_p2), %vm1428_vm0, %v1429_v1  ;;  %s1431_s24 = smov (!%p123_p2), 32  }
   0xd   : > { %s1462_s11 = scalar_select %p149_p3, %s1453_s10, 1 }
   0xe   : > { %s1493_s16 = scalar_select %p168_p4, 0, 7 }
   0xf   : > { %s1164_s12 = sshll.u32 %s1462_s11, 5  ;;  %s1163_s17 = sshll.u32 %s1462_s11, 4 }
  0x10   : > { %s158_s15 = scalar_lea.vmem %s1645_s1, %s1164_s12  ;;  %s1501_s20 = scalar_lea.vmem %s1644_s0, %s1163_s17 }
  0x11   : > { %v164_v2 = vld [vmem:[%s158_s15] sm:$0xff]  ;;  %v165_v3 = vld [vmem:[%s158_s15 + $0x8] sm:$0xff]  ;;  %v166_v4 = vld [vmem:[%s158_s15 + $0x10] sm:$0xff]  ;;  %s1138_s21 = sshll.u32 %s1493_s16, 1  ;;  %s1516_s27 = scalar_lea.vmem %s1646_s2, %s1163_s17 }
  0x12   : > { %v1471_v5 = vpack.c.bf16 %v165_v3, %v164_v2  ;;  %v167_v6 = vld [vmem:[%s158_s15 + $0x18] sm:$0xff]  ;;  %s171_s22 = scalar_lea.vmem %s1501_s20, %s1138_s21  ;;  %s276_s28 = scalar_lea.vmem %s1516_s27, %s1138_s21 }
  0x13   : > { %v1474_v7 = vpack.c.bf16 %v167_v6, %v166_v4  ;;  %v172_v8 = vld [vmem:[%s171_s22] sm:$0x3]  ;;  %s1531_s29 = scalar_select %p168_p4, 1, 6 }
  0x14   : > { %1296 = vmatpush3.bf16.msra.mxu0 %v1471_v5  ;;  %1302 = vmatpush3.bf16.msra.mxu1 %v1471_v5  ;;  %s1550_s5 = scalar_select %p168_p4, 2, 5 }
  0x15   : > { %1297 = vmatprep.subr.bf16.mxu0 %v1427_v0  ;;  %1303 = vmatprep.subr.bf16.mxu1 %v1427_v0  ;;  %s1140_s30 = sshll.u32 %s1531_s29, 1 }
  0x16   : > { %s281_s3 = scalar_lea.vmem %s1501_s20, %s1140_s30  ;;  %s384_s4 = scalar_lea.vmem %s1516_s27, %s1140_s30 }
  0x17   : > { %v282_v26 = vld [vmem:[%s281_s3] sm:$0x3]  ;;  %s1143_s6 = sshll.u32 %s1550_s5, 1 }
  0x18   : > { %1299 = vmatpush3.bf16.msra.mxu0 %v1474_v7  ;;  %1305 = vmatpush3.bf16.msra.mxu1 %v1474_v7  ;;  %s388_s7 = scalar_lea.vmem %s1501_s20, %s1143_s6  ;;  %s491_s8 = scalar_lea.vmem %s1516_s27, %s1143_s6 }
  0x19   : > { %1306 = vmatprep.subr.bf16.mxu0 %v1427_v0  ;;  %1312 = vmatprep.subr.bf16.mxu1 %v1427_v0  ;;  %v389_v44 = vld [vmem:[%s388_s7] sm:$0x3]  ;;  %s1569_s11 = scalar_select %p168_p4, 3, 4 }
  0x1a   : > { %s1587_s15 = scalar_select %p168_p4, 4, 3 }
  0x1b   : > { %1215 = vmatmul.mubr.f32.vlgmr.msra.gmra.mrb[0].mxu0 %v1429_v1  ;;  %s1146_s12 = sshll.u32 %s1569_s11, 1 }
  0x1c   : > { %1308 = vmatpush3.bf16.msra.mxu0 %v1471_v5  ;;  %1236 = vmatprep.mubr.msk.f32.mxu0 %vm1428_vm0, %v1429_v1  ;;  %s495_s13 = scalar_lea.vmem %s1501_s20, %s1146_s12  ;;  %s598_s14 = scalar_lea.vmem %s1516_s27, %s1146_s12 }
  0x1d   : > { %1309 = vmatprep.subr.bf16.mxu0 %v1427_v0  ;;  %v496_v62 = vld [vmem:[%s495_s13] sm:$0x3]  ;;  %s1149_s16 = sshll.u32 %s1587_s15, 1 }
  0x1e   : > { %s602_s17 = scalar_lea.vmem %s1501_s20, %s1149_s16  ;;  %s705_s18 = scalar_lea.vmem %s1516_s27, %s1149_s16 }
  0x1f   : > { %s1605_s19 = scalar_select %p168_p4, 5, 2 }
  0x20   : > { %1311 = vmatpush3.bf16.msra.mxu0 %v1474_v7  ;;  %s1618_s26 = scalar_select %p168_p4, 6, 1 }
  0x21   : > { %1318 = vmatprep.subr.bf16.mxu0 %v1427_v0  ;;  %s1152_s21 = sshll.u32 %s1605_s19, 1 }
  0x22   : > { %s709_s22 = scalar_lea.vmem %s1501_s20, %s1152_s21  ;;  %s812_s25 = scalar_lea.vmem %s1516_s27, %s1152_s21 }
  0x23   : > { %s1631_s3 = scalar_select %p168_p4, 7, 0 }
  0xee   : > { %v243_v9 = vpop.f32.mrb[0].mxu0 }
  0xef   : > { %v247_v10 = vadd.f32 %v243_v9, %v172_v8  ;;  %v1216_v11 = vpop.f32.mrb[1].mxu0 }
  0xf1   : > { %1355 = vtanh.f32 %v247_v10  ;;  %v1139_v13 = vmul.f32 -1.442695, %v247_v10 }
  0xf3   : > { %1357 = vpow2.f32 %v1139_v13 }
  0xfb   : > { %v1356_v12 = vpop.eup %1355 }
  0xfc   : > { %257 = vrot.lane.b32.xlu0 %v1356_v12, %s1430_s23 }
  0xfd   : > { %v1358_v14 = vpop.eup %1357 }
  0xfe   : > { %v251_v15 = vadd.f32 1.0, %v1358_v14 }
 0x100   : > { %1359 = vrcp.f32 %v251_v15 }
 0x10a   : > { %v1360_v16 = vpop.eup %1359 }
 0x10b   : > { %v255_v19 = vmul.f32 0.0, %v1360_v16 }
 0x16e   : > { %v258_v17 = vpop.permute.xlu0 %257 }
 0x16f   : > { %v260_v18 = vmul.f32 %v1360_v16, %v258_v17 }
 0x171   : > { %262 = vrot.lane.b32.xlu0 %v260_v18, %s1431_s24 }
 0x1e3   : > { %v263_v20 = vpop.permute.xlu0 %262 }
 0x1e4   : > { %v265_v21 = vadd.f32 %v263_v20, %v255_v19  ;;  %v603_v20 = vld [vmem:[%s602_s17] sm:$0x3] }
 0x1e6   : > { %1361 = vtanh.f32 %v265_v21 }
 0x1f0   : > { %v1362_v22 = vpop.eup %1361 }
 0x1f1   : > { %268 = vrot.lane.b32.xlu1 %v1362_v22, %s1430_s23 }
 0x263   : > { %v269_v23 = vpop.permute.xlu1 %268 }
 0x264   : > { %v271_v24 = vmul.f32 %v1360_v16, %v269_v23 }
 0x266   : > { %273 = vrot.lane.b32.xlu1 %v271_v24, %s1431_s24 }
 0x2d8   : > { %v274_v25 = vpop.permute.xlu1 %273 }
 0x2d9   : > { %278 = vst.msk [vmem:[%s276_s28] sm:$0x3] %vm277_vm1, %v274_v25  ;;  %1226 = vmatmul.mubr.msk.f32.vlgmr.msra.gmra.mrb[0].mxu1 %vm173_vm2, %v274_v25  ;;  %s1155_s28 = sshll.u32 %s1618_s26, 1 }
 0x2da   : > { %1314 = vmatpush3.bf16.msra.mxu1 %v1471_v5  ;;  %1247 = vmatprep.mubr.msk.f32.mxu1 %vm1428_vm0, %v1429_v1  ;;  %s816_s29 = scalar_lea.vmem %s1501_s20, %s1155_s28  ;;  %s919_s30 = scalar_lea.vmem %s1516_s27, %s1155_s28 }
 0x2db   : > { %1315 = vmatprep.subr.bf16.mxu1 %v1427_v0 }
 0x2de   : > { %1317 = vmatpush3.bf16.msra.mxu1 %v1474_v7 }
 0x2df   : > { %1324 = vmatprep.subr.bf16.mxu1 %v1427_v0 }
 0x3ac   : > { %v351_v27 = vpop.f32.mrb[0].mxu1 }
 0x3ad   : > { %v355_v28 = vadd.f32 %v351_v27, %v282_v26  ;;  %v1227_v29 = vpop.f32.mrb[1].mxu1 }
 0x3af   : > { %1363 = vtanh.f32 %v355_v28  ;;  %v1142_v31 = vmul.f32 -1.442695, %v355_v28 }
 0x3b1   : > { %1365 = vpow2.f32 %v1142_v31 }
 0x3b9   : > { %v1364_v30 = vpop.eup %1363 }
 0x3ba   : > { %365 = vrot.lane.b32.xlu0 %v1364_v30, %s1430_s23 }
 0x3bb   : > { %v1366_v32 = vpop.eup %1365 }
 0x3bc   : > { %v359_v33 = vadd.f32 1.0, %v1366_v32 }
 0x3be   : > { %1367 = vrcp.f32 %v359_v33 }
 0x3c8   : > { %v1368_v34 = vpop.eup %1367 }
 0x3c9   : > { %v363_v37 = vmul.f32 %v1368_v34, %v265_v21 }
 0x42c   : > { %v366_v35 = vpop.permute.xlu0 %365 }
 0x42d   : > { %v368_v36 = vmul.f32 %v1368_v34, %v366_v35 }
 0x42f   : > { %370 = vrot.lane.b32.xlu1 %v368_v36, %s1431_s24 }
 0x4a1   : > { %v371_v38 = vpop.permute.xlu1 %370 }
 0x4a2   : > { %v373_v39 = vadd.f32 %v371_v38, %v363_v37  ;;  %v710_v38 = vld [vmem:[%s709_s22] sm:$0x3] }
 0x4a4   : > { %1369 = vtanh.f32 %v373_v39 }
 0x4ae   : > { %v1370_v40 = vpop.eup %1369 }
 0x4af   : > { %376 = vrot.lane.b32.xlu0 %v1370_v40, %s1430_s23 }
 0x521   : > { %v377_v41 = vpop.permute.xlu0 %376 }
 0x522   : > { %v379_v42 = vmul.f32 %v1368_v34, %v377_v41 }
 0x524   : > { %381 = vrot.lane.b32.xlu1 %v379_v42, %s1431_s24 }
 0x596   : > { %v382_v43 = vpop.permute.xlu1 %381 }
 0x597   : > { %385 = vst.msk [vmem:[%s384_s4] sm:$0x3] %vm277_vm1, %v382_v43  ;;  %1237 = vmatmul.mubr.msk.f32.vlgmr.msra.gmra.mrb[2].mxu0 %vm173_vm2, %v382_v43  ;;  %s1158_s4 = sshll.u32 %s1631_s3, 1 }
 0x598   : > { %1320 = vmatpush3.bf16.msra.mxu0 %v1471_v5  ;;  %1258 = vmatprep.mubr.msk.f32.mxu0 %vm1428_vm0, %v1429_v1  ;;  %s923_s5 = scalar_lea.vmem %s1501_s20, %s1158_s4  ;;  %s1026_s10 = scalar_lea.vmem %s1516_s27, %s1158_s4 }
 0x599   : > { %1321 = vmatprep.subr.bf16.mxu0 %v1427_v0 }
 0x59c   : > { %1323 = vmatpush3.bf16.msra.mxu0 %v1474_v7 }
 0x59d   : > { %1330 = vmatprep.subr.bf16.mxu0 %v1427_v0 }
 0x66a   : > { %v458_v45 = vpop.f32.mrb[2].mxu0 }
 0x66b   : > { %v462_v46 = vadd.f32 %v458_v45, %v389_v44  ;;  %v1238_v47 = vpop.f32.mrb[3].mxu0 }
 0x66d   : > { %1371 = vtanh.f32 %v462_v46  ;;  %v1145_v49 = vmul.f32 -1.442695, %v462_v46 }
 0x66f   : > { %1373 = vpow2.f32 %v1145_v49 }
 0x677   : > { %v1372_v48 = vpop.eup %1371 }
 0x678   : > { %472 = vrot.lane.b32.xlu0 %v1372_v48, %s1430_s23 }
 0x679   : > { %v1374_v50 = vpop.eup %1373 }
 0x67a   : > { %v466_v51 = vadd.f32 1.0, %v1374_v50 }
 0x67c   : > { %1375 = vrcp.f32 %v466_v51 }
 0x686   : > { %v1376_v52 = vpop.eup %1375 }
 0x687   : > { %v470_v55 = vmul.f32 %v1376_v52, %v373_v39 }
 0x6ea   : > { %v473_v53 = vpop.permute.xlu0 %472 }
 0x6eb   : > { %v475_v54 = vmul.f32 %v1376_v52, %v473_v53 }
 0x6ed   : > { %477 = vrot.lane.b32.xlu1 %v475_v54, %s1431_s24 }
 0x75f   : > { %v478_v56 = vpop.permute.xlu1 %477 }
 0x760   : > { %v480_v57 = vadd.f32 %v478_v56, %v470_v55 }
 0x762   : > { %1377 = vtanh.f32 %v480_v57 }
 0x76c   : > { %v1378_v58 = vpop.eup %1377 }
 0x76d   : > { %483 = vrot.lane.b32.xlu0 %v1378_v58, %s1430_s23 }
 0x7df   : > { %v484_v59 = vpop.permute.xlu0 %483 }
 0x7e0   : > { %v486_v60 = vmul.f32 %v1376_v52, %v484_v59  ;;  %v817_v52 = vld [vmem:[%s816_s29] sm:$0x3] }
 0x7e2   : > { %488 = vrot.lane.b32.xlu1 %v486_v60, %s1431_s24 }
 0x854   : > { %v489_v61 = vpop.permute.xlu1 %488 }
 0x855   : > { %492 = vst.msk [vmem:[%s491_s8] sm:$0x3] %vm277_vm1, %v489_v61  ;;  %1248 = vmatmul.mubr.msk.f32.vlgmr.msra.gmra.mrb[2].mxu1 %vm173_vm2, %v489_v61 }
 0x856   : > { %1326 = vmatpush3.bf16.msra.mxu1 %v1471_v5  ;;  %1269 = vmatprep.mubr.msk.f32.mxu1 %vm1428_vm0, %v1429_v1 }
 0x857   : > { %1327 = vmatprep.subr.bf16.mxu1 %v1427_v0 }
 0x85a   : > { %1329 = vmatpush3.bf16.msra.mxu1 %v1474_v7 }
 0x85b   : > { %1336 = vmatprep.subr.bf16.mxu1 %v1427_v0 }
 0x928   : > { %v565_v63 = vpop.f32.mrb[2].mxu1 }
 0x929   : > { %v569_v2 = vadd.f32 %v565_v63, %v496_v62  ;;  %v1249_v3 = vpop.f32.mrb[3].mxu1 }
 0x92b   : > { %1379 = vtanh.f32 %v569_v2  ;;  %v1148_v6 = vmul.f32 -1.442695, %v569_v2 }
 0x92d   : > { %1381 = vpow2.f32 %v1148_v6 }
 0x935   : > { %v1380_v4 = vpop.eup %1379 }
 0x936   : > { %579 = vrot.lane.b32.xlu0 %v1380_v4, %s1430_s23 }
 0x937   : > { %v1382_v8 = vpop.eup %1381 }
 0x938   : > { %v573_v9 = vadd.f32 1.0, %v1382_v8 }
 0x93a   : > { %1383 = vrcp.f32 %v573_v9 }
 0x944   : > { %v1384_v10 = vpop.eup %1383 }
 0x945   : > { %v577_v13 = vmul.f32 %v1384_v10, %v480_v57 }
 0x9a8   : > { %v580_v11 = vpop.permute.xlu0 %579 }
 0x9a9   : > { %v582_v12 = vmul.f32 %v1384_v10, %v580_v11 }
 0x9ab   : > { %584 = vrot.lane.b32.xlu1 %v582_v12, %s1431_s24 }
 0xa1d   : > { %v585_v14 = vpop.permute.xlu1 %584 }
 0xa1e   : > { %v587_v15 = vadd.f32 %v585_v14, %v577_v13 }
 0xa20   : > { %1385 = vtanh.f32 %v587_v15 }
 0xa2a   : > { %v1386_v16 = vpop.eup %1385 }
 0xa2b   : > { %590 = vrot.lane.b32.xlu0 %v1386_v16, %s1430_s23 }
 0xa9d   : > { %v591_v17 = vpop.permute.xlu0 %590 }
 0xa9e   : > { %v593_v18 = vmul.f32 %v1384_v10, %v591_v17  ;;  %v924_v10 = vld [vmem:[%s923_s5] sm:$0x3] }
 0xaa0   : > { %595 = vrot.lane.b32.xlu1 %v593_v18, %s1431_s24 }
 0xb12   : > { %v596_v19 = vpop.permute.xlu1 %595 }
 0xb13   : > { %599 = vst.msk [vmem:[%s598_s14] sm:$0x3] %vm277_vm1, %v596_v19  ;;  %1259 = vmatmul.mubr.msk.f32.vlgmr.msra.gmra.mrb[4].mxu0 %vm173_vm2, %v596_v19 }
 0xb14   : > { %1332 = vmatpush3.bf16.msra.mxu0 %v1471_v5  ;;  %1280 = vmatprep.mubr.msk.f32.mxu0 %vm1428_vm0, %v1429_v1 }
 0xb15   : > { %1333 = vmatprep.subr.bf16.mxu0 %v1427_v0 }
 0xb18   : > { %1335 = vmatpush3.bf16.msra.mxu0 %v1474_v7 }
 0xbe6   : > { %v672_v21 = vpop.f32.mrb[4].mxu0 }
 0xbe7   : > { %v676_v22 = vadd.f32 %v672_v21, %v603_v20  ;;  %v1260_v23 = vpop.f32.mrb[5].mxu0 }
 0xbe9   : > { %1387 = vtanh.f32 %v676_v22  ;;  %v1151_v25 = vmul.f32 -1.442695, %v676_v22 }
 0xbeb   : > { %1389 = vpow2.f32 %v1151_v25 }
 0xbf3   : > { %v1388_v24 = vpop.eup %1387 }
 0xbf4   : > { %686 = vrot.lane.b32.xlu0 %v1388_v24, %s1430_s23 }
 0xbf5   : > { %v1390_v26 = vpop.eup %1389 }
 0xbf6   : > { %v680_v27 = vadd.f32 1.0, %v1390_v26 }
 0xbf8   : > { %1391 = vrcp.f32 %v680_v27 }
 0xc02   : > { %v1392_v28 = vpop.eup %1391 }
 0xc03   : > { %v684_v31 = vmul.f32 %v1392_v28, %v587_v15 }
 0xc66   : > { %v687_v29 = vpop.permute.xlu0 %686 }
 0xc67   : > { %v689_v30 = vmul.f32 %v1392_v28, %v687_v29 }
 0xc69   : > { %691 = vrot.lane.b32.xlu1 %v689_v30, %s1431_s24 }
 0xcdb   : > { %v692_v32 = vpop.permute.xlu1 %691 }
 0xcdc   : > { %v694_v33 = vadd.f32 %v692_v32, %v684_v31 }
 0xcde   : > { %1393 = vtanh.f32 %v694_v33 }
 0xce8   : > { %v1394_v34 = vpop.eup %1393 }
 0xce9   : > { %697 = vrot.lane.b32.xlu0 %v1394_v34, %s1430_s23 }
 0xd5b   : > { %v698_v35 = vpop.permute.xlu0 %697 }
 0xd5c   : > { %v700_v36 = vmul.f32 %v1392_v28, %v698_v35 }
 0xd5e   : > { %702 = vrot.lane.b32.xlu1 %v700_v36, %s1431_s24 }
 0xdd0   : > { %v703_v37 = vpop.permute.xlu1 %702 }
 0xdd1   : > { %706 = vst.msk [vmem:[%s705_s18] sm:$0x3] %vm277_vm1, %v703_v37  ;;  %1270 = vmatmul.mubr.msk.f32.vlgmr.msra.gmra.mrb[4].mxu1 %vm173_vm2, %v703_v37 }
 0xdd2   : > { %1338 = vmatpush3.bf16.msra.mxu1 %v1471_v5  ;;  %1291 = vmatprep.mubr.msk.f32.mxu1 %vm1428_vm0, %v1429_v1 }
 0xdd3   : > { %1339 = vmatprep.subr.bf16.mxu1 %v1427_v0 }
 0xdd6   : > { %1341 = vmatpush3.bf16.msra.mxu1 %v1474_v7 }
 0xea4   : > { %v779_v39 = vpop.f32.mrb[4].mxu1 }
 0xea5   : > { %v783_v40 = vadd.f32 %v779_v39, %v710_v38  ;;  %v1271_v41 = vpop.f32.mrb[5].mxu1 }
 0xea7   : > { %1395 = vtanh.f32 %v783_v40  ;;  %v1154_v5 = vmul.f32 -1.442695, %v783_v40 }
 0xea9   : > { %1397 = vpow2.f32 %v1154_v5 }
 0xeb1   : > { %v1396_v42 = vpop.eup %1395 }
 0xeb2   : > { %793 = vrot.lane.b32.xlu0 %v1396_v42, %s1430_s23 }
 0xeb3   : > { %v1398_v1 = vpop.eup %1397 }
 0xeb4   : > { %v787_v0 = vadd.f32 1.0, %v1398_v1 }
 0xeb6   : > { %1399 = vrcp.f32 %v787_v0 }
 0xec0   : > { %v1400_v7 = vpop.eup %1399 }
 0xec1   : > { %v791_v45 = vmul.f32 %v1400_v7, %v694_v33 }
 0xf24   : > { %v794_v43 = vpop.permute.xlu0 %793 }
 0xf25   : > { %v796_v44 = vmul.f32 %v1400_v7, %v794_v43 }
 0xf27   : > { %798 = vrot.lane.b32.xlu1 %v796_v44, %s1431_s24 }
 0xf99   : > { %v799_v46 = vpop.permute.xlu1 %798 }
 0xf9a   : > { %v801_v47 = vadd.f32 %v799_v46, %v791_v45 }
 0xf9c   : > { %1401 = vtanh.f32 %v801_v47 }
 0xfa6   : > { %v1402_v48 = vpop.eup %1401 }
 0xfa7   : > { %804 = vrot.lane.b32.xlu0 %v1402_v48, %s1430_s23 }
0x1019   : > { %v805_v49 = vpop.permute.xlu0 %804 }
0x101a   : > { %v807_v50 = vmul.f32 %v1400_v7, %v805_v49 }
0x101c   : > { %809 = vrot.lane.b32.xlu1 %v807_v50, %s1431_s24 }
0x108e   : > { %v810_v51 = vpop.permute.xlu1 %809 }
0x108f   : > { %813 = vst.msk [vmem:[%s812_s25] sm:$0x3] %vm277_vm1, %v810_v51  ;;  %1281 = vmatmul.mubr.msk.f32.vlgmr.msra.gmra.mrb[6].mxu0 %vm173_vm2, %v810_v51 }
0x1162   : > { %v886_v53 = vpop.f32.mrb[6].mxu0 }
0x1163   : > { %v890_v54 = vadd.f32 %v886_v53, %v817_v52  ;;  %v1282_v55 = vpop.f32.mrb[7].mxu0 }
0x1165   : > { %1403 = vtanh.f32 %v890_v54  ;;  %v1157_v57 = vmul.f32 -1.442695, %v890_v54 }
0x1167   : > { %1405 = vpow2.f32 %v1157_v57 }
0x116f   : > { %v1404_v56 = vpop.eup %1403 }
0x1170   : > { %900 = vrot.lane.b32.xlu0 %v1404_v56, %s1430_s23 }
0x1171   : > { %v1406_v58 = vpop.eup %1405 }
0x1172   : > { %v894_v59 = vadd.f32 1.0, %v1406_v58 }
0x1174   : > { %1407 = vrcp.f32 %v894_v59 }
0x117e   : > { %v1408_v60 = vpop.eup %1407 }
0x117f   : > { %v898_v63 = vmul.f32 %v1408_v60, %v801_v47 }
0x11e2   : > { %v901_v61 = vpop.permute.xlu0 %900 }
0x11e3   : > { %v903_v62 = vmul.f32 %v1408_v60, %v901_v61 }
0x11e5   : > { %905 = vrot.lane.b32.xlu1 %v903_v62, %s1431_s24 }
0x1257   : > { %v906_v2 = vpop.permute.xlu1 %905 }
0x1258   : > { %v908_v3 = vadd.f32 %v906_v2, %v898_v63 }
0x125a   : > { %1409 = vtanh.f32 %v908_v3 }
0x1264   : > { %v1410_v4 = vpop.eup %1409 }
0x1265   : > { %911 = vrot.lane.b32.xlu0 %v1410_v4, %s1430_s23 }
0x12d7   : > { %v912_v6 = vpop.permute.xlu0 %911 }
0x12d8   : > { %v914_v8 = vmul.f32 %v1408_v60, %v912_v6 }
0x12da   : > { %916 = vrot.lane.b32.xlu1 %v914_v8, %s1431_s24 }
0x134c   : > { %v917_v9 = vpop.permute.xlu1 %916 }
0x134d   : > { %920 = vst.msk [vmem:[%s919_s30] sm:$0x3] %vm277_vm1, %v917_v9  ;;  %1292 = vmatmul.mubr.msk.f32.vlgmr.msra.gmra.mrb[6].mxu1 %vm173_vm2, %v917_v9 }
0x1420   : > { %v993_v11 = vpop.f32.mrb[6].mxu1 }
0x1421   : > { %v997_v12 = vadd.f32 %v993_v11, %v924_v10  ;;  %v1293_v13 = vpop.f32.mrb[7].mxu1 }
0x1423   : > { %1411 = vtanh.f32 %v997_v12  ;;  %v1160_v15 = vmul.f32 -1.442695, %v997_v12 }
0x1425   : > { %1413 = vpow2.f32 %v1160_v15 }
0x142d   : > { %v1412_v14 = vpop.eup %1411 }
0x142e   : > { %1007 = vrot.lane.b32.xlu0 %v1412_v14, %s1430_s23 }
0x142f   : > { %v1414_v16 = vpop.eup %1413 }
0x1430   : > { %v1001_v17 = vadd.f32 1.0, %v1414_v16 }
0x1432   : > { %1415 = vrcp.f32 %v1001_v17 }
0x143c   : > { %v1416_v18 = vpop.eup %1415 }
0x143d   : > { %v1005_v21 = vmul.f32 %v1416_v18, %v908_v3 }
0x14a0   : > { %v1008_v19 = vpop.permute.xlu0 %1007 }
0x14a1   : > { %v1010_v20 = vmul.f32 %v1416_v18, %v1008_v19 }
0x14a3   : > { %1012 = vrot.lane.b32.xlu1 %v1010_v20, %s1431_s24 }
0x1515   : > { %v1013_v22 = vpop.permute.xlu1 %1012 }
0x1516   : > { %v1015_v23 = vadd.f32 %v1013_v22, %v1005_v21 }
0x1518   : > { %1417 = vtanh.f32 %v1015_v23 }
0x1522   : > { %v1418_v24 = vpop.eup %1417 }
0x1523   : > { %1018 = vrot.lane.b32.xlu0 %v1418_v24, %s1430_s23 }
0x1595   : > { %v1019_v25 = vpop.permute.xlu0 %1018 }
0x1596   : > { %v1021_v26 = vmul.f32 %v1416_v18, %v1019_v25 }
0x1598   : > { %1023 = vrot.lane.b32.xlu1 %v1021_v26, %s1431_s24 }
0x160a   : > { %v1024_v27 = vpop.permute.xlu1 %1023 }
0x160b   : > { %1027 = vst.msk [vmem:[%s1026_s10] sm:$0x3] %vm277_vm1, %v1024_v27 }
0x160c PF: > { %s12_s9 = sadd.s32 1, %s1425_s9  }
0x160d   : > { %p9_p5 = scmp.ge.s32.totalorder %s12_s9, 4  }
0x160f   :  { %11 = sbr.rel (!%p9_p5) target bundleno = 1 (0x1), region = 77 }

// kernel: lstm_model_forward.8
= control target key start
LH: loop header
LB: loop body
LE: loop exit
PB: predicated region body
PF: predicated region fallthrough
CT: control target
= control target key end

     0   :  { %s1403_s9 = smov 0   ;;  %s1551_s0 = inlined_call_operand.vmem [shape: f32[2,8,2,128], index: 0, kind: input, shape index: {}]   ;;  %s1552_s1 = inlined_call_operand.vmem [shape: f32[2,32,128], index: 1, kind: input, shape index: {}]   ;;  %s1553_s2 = inlined_call_operand.vmem [shape: f32[2,2,32], index: 2, kind: output, shape index: {}]  }
   0x1 LB: > { %s1409_s10 = sadd.s32 4294967295, %s1381_s9   ;;  %p1089_p0 = scmp.ge.s32.totalorder %s1381_s9, 1  ;;  %s1381_s9 = sphi %s1403_s9, %s12_s9  }
   0x2   : > { %p122_p1 = scmp.lt.s32.totalorder %s1381_s9, 3 }
   0x4   : > { %p123_p2 = pnand %p1089_p0, %p122_p1 }
   0x5   : > { %p148_p3 = scmp.lt.s32.totalorder (!%p123_p2), %s1409_s10, 1  ;;  %v1383_v0 = vmov (!%p123_p2), 0.0|0.0   ;;  %vm1384_vm0 = vmmov (!%p123_p2), 0   ;;  %v1385_v1 = vmov (!%p123_p2), 0.0   ;;  %p166_p4 = scmp.eq.s32.totalorder (!%p123_p2), %s1409_s10, 0  ;;  %vm171_vm1 = vcmask (!%p123_p2), 261120  }
   0x6   : > { %126 = sbr.rel (%p123_p2) target bundleno = 5644 (0x160c), region = 28  ;;  %1250 = vmatprep.subr.bf16.mxu0 (!%p123_p2), %v1383_v0  ;;  %1170 = vmatprep.mubr.msk.f32.mxu0 (!%p123_p2), %vm1384_vm0, %v1385_v1  ;;  %s1386_s23 = smov (!%p123_p2), 64   ;;  %vm1002_vm2 = vcmask (!%p123_p2), 254976  }
   0x7   : > { %1256 = vmatprep.subr.bf16.mxu1 (!%p123_p2), %v1383_v0  ;;  %1181 = vmatprep.mubr.msk.f32.mxu1 (!%p123_p2), %vm1384_vm0, %v1385_v1  ;;  %s1387_s24 = smov (!%p123_p2), 32  }
   0xd   : > { %s1418_s11 = scalar_select %p148_p3, %s1409_s10, 1 }
   0xe   : > { %s167_s16 = scalar_select %p166_p4, 0, 7 }
   0xf   : > { %s1121_s12 = sshll.u32 %s1418_s11, 5  ;;  %s1120_s17 = sshll.u32 %s1418_s11, 4 }
  0x10   : > { %s157_s15 = scalar_lea.vmem %s1552_s1, %s1121_s12  ;;  %s1453_s20 = scalar_lea.vmem %s1551_s0, %s1120_s17 }
  0x11   : > { %v162_v2 = vld [vmem:[%s157_s15] sm:$0xff]  ;;  %v163_v3 = vld [vmem:[%s157_s15 + $0x8] sm:$0xff]  ;;  %v164_v4 = vld [vmem:[%s157_s15 + $0x10] sm:$0xff]  ;;  %s1095_s21 = sshll.u32 %s167_s16, 1  ;;  %s1094_s10 = sshll.u32 %s1418_s11, 1 }
  0x12   : > { %v1427_v5 = vpack.c.bf16 %v163_v3, %v162_v2  ;;  %v165_v6 = vld [vmem:[%s157_s15 + $0x18] sm:$0xff]  ;;  %s169_s22 = scalar_lea.vmem %s1453_s20, %s1095_s21 }
  0x13   : > { %v1430_v7 = vpack.c.bf16 %v165_v6, %v164_v4  ;;  %v170_v8 = vld [vmem:[%s169_s22] sm:$0x3]  ;;  %s270_s25 = scalar_select %p166_p4, 1, 6 }
  0x14   : > { %1252 = vmatpush3.bf16.msra.mxu0 %v1427_v5  ;;  %1258 = vmatpush3.bf16.msra.mxu1 %v1427_v5  ;;  %s374_s28 = scalar_select %p166_p4, 2, 5 }
  0x15   : > { %1253 = vmatprep.subr.bf16.mxu0 %v1383_v0  ;;  %1259 = vmatprep.subr.bf16.mxu1 %v1383_v0  ;;  %s1097_s26 = sshll.u32 %s270_s25, 1  ;;  %s161_s25 = scalar_lea.vmem %s1553_s2, %s1094_s10 }
  0x16   : > { %s272_s27 = scalar_lea.vmem %s1453_s20, %s1097_s26  ;;  %s1100_s29 = sshll.u32 %s374_s28, 1 }
  0x17   : > { %v273_v26 = vld [vmem:[%s272_s27] sm:$0x3]  ;;  %s376_s30 = scalar_lea.vmem %s1453_s20, %s1100_s29 }
  0x18   : > { %1255 = vmatpush3.bf16.msra.mxu0 %v1430_v7  ;;  %1261 = vmatpush3.bf16.msra.mxu1 %v1430_v7  ;;  %v377_v44 = vld [vmem:[%s376_s30] sm:$0x3]  ;;  %s478_s3 = scalar_select %p166_p4, 3, 4 }
  0x19   : > { %1262 = vmatprep.subr.bf16.mxu0 %v1383_v0  ;;  %1268 = vmatprep.subr.bf16.mxu1 %v1383_v0  ;;  %s582_s6 = scalar_select %p166_p4, 4, 3 }
  0x1a   : > { %s1103_s4 = sshll.u32 %s478_s3, 1 }
  0x1b   : > { %1171 = vmatmul.mubr.f32.vlgmr.msra.gmra.mrb[0].mxu0 %v1385_v1  ;;  %s480_s5 = scalar_lea.vmem %s1453_s20, %s1103_s4  ;;  %s1106_s7 = sshll.u32 %s582_s6, 1 }
  0x1c   : > { %1264 = vmatpush3.bf16.msra.mxu0 %v1427_v5  ;;  %1192 = vmatprep.mubr.msk.f32.mxu0 %vm1384_vm0, %v1385_v1  ;;  %v481_v62 = vld [vmem:[%s480_s5] sm:$0x3]  ;;  %s584_s8 = scalar_lea.vmem %s1453_s20, %s1106_s7 }
  0x1d   : > { %1265 = vmatprep.subr.bf16.mxu0 %v1383_v0  ;;  %s686_s12 = scalar_select %p166_p4, 5, 2 }
  0x1e   : > { %s790_s15 = scalar_select %p166_p4, 6, 1 }
  0x1f   : > { %s1109_s13 = sshll.u32 %s686_s12, 1 }
  0x20   : > { %1267 = vmatpush3.bf16.msra.mxu0 %v1430_v7  ;;  %s688_s14 = scalar_lea.vmem %s1453_s20, %s1109_s13  ;;  %s1112_s16 = sshll.u32 %s790_s15, 1 }
  0x21   : > { %1274 = vmatprep.subr.bf16.mxu0 %v1383_v0  ;;  %s792_s17 = scalar_lea.vmem %s1453_s20, %s1112_s16 }
  0x22   : > { %s894_s18 = scalar_select %p166_p4, 7, 0 }
  0x24   : > { %s1115_s19 = sshll.u32 %s894_s18, 1 }
  0x25   : > { %s896_s21 = scalar_lea.vmem %s1453_s20, %s1115_s19 }
  0xee   : > { %v241_v9 = vpop.f32.mrb[0].mxu0 }
  0xef   : > { %v245_v10 = vadd.f32 %v241_v9, %v170_v8  ;;  %v1172_v11 = vpop.f32.mrb[1].mxu0 }
  0xf1   : > { %1311 = vtanh.f32 %v245_v10  ;;  %v1096_v13 = vmul.f32 -1.442695, %v245_v10 }
  0xf3   : > { %1313 = vpow2.f32 %v1096_v13 }
  0xfb   : > { %v1312_v12 = vpop.eup %1311 }
  0xfc   : > { %255 = vrot.lane.b32.xlu0 %v1312_v12, %s1386_s23 }
  0xfd   : > { %v1314_v14 = vpop.eup %1313 }
  0xfe   : > { %v249_v15 = vadd.f32 1.0, %v1314_v14 }
 0x100   : > { %1315 = vrcp.f32 %v249_v15 }
 0x10a   : > { %v1316_v16 = vpop.eup %1315 }
 0x10b   : > { %v253_v19 = vmul.f32 0.0, %v1316_v16 }
 0x16e   : > { %v256_v17 = vpop.permute.xlu0 %255 }
 0x16f   : > { %v258_v18 = vmul.f32 %v1316_v16, %v256_v17 }
 0x171   : > { %260 = vrot.lane.b32.xlu0 %v258_v18, %s1387_s24 }
 0x1e3   : > { %v261_v20 = vpop.permute.xlu0 %260 }
 0x1e4   : > { %v263_v21 = vadd.f32 %v261_v20, %v253_v19  ;;  %v585_v20 = vld [vmem:[%s584_s8] sm:$0x3] }
 0x1e6   : > { %1317 = vtanh.f32 %v263_v21 }
 0x1f0   : > { %v1318_v22 = vpop.eup %1317 }
 0x1f1   : > { %266 = vrot.lane.b32.xlu1 %v1318_v22, %s1386_s23 }
 0x263   : > { %v267_v23 = vpop.permute.xlu1 %266 }
 0x264   : > { %v269_v24 = vmul.f32 %v1316_v16, %v267_v23 }
 0x266   : > { %275 = vrot.lane.b32.xlu1 %v269_v24, %s1387_s24 }
 0x2d8   : > { %v276_v25 = vpop.permute.xlu1 %275 }
 0x2d9   : > { %1182 = vmatmul.mubr.msk.f32.vlgmr.msra.gmra.mrb[0].mxu1 %vm171_vm1, %v276_v25 }
 0x2da   : > { %1270 = vmatpush3.bf16.msra.mxu1 %v1427_v5  ;;  %1203 = vmatprep.mubr.msk.f32.mxu1 %vm1384_vm0, %v1385_v1 }
 0x2db   : > { %1271 = vmatprep.subr.bf16.mxu1 %v1383_v0 }
 0x2de   : > { %1273 = vmatpush3.bf16.msra.mxu1 %v1430_v7 }
 0x2df   : > { %1280 = vmatprep.subr.bf16.mxu1 %v1383_v0 }
 0x3ac   : > { %v345_v27 = vpop.f32.mrb[0].mxu1 }
 0x3ad   : > { %v349_v28 = vadd.f32 %v345_v27, %v273_v26  ;;  %v1183_v29 = vpop.f32.mrb[1].mxu1 }
 0x3af   : > { %1319 = vtanh.f32 %v349_v28  ;;  %v1099_v31 = vmul.f32 -1.442695, %v349_v28 }
 0x3b1   : > { %1321 = vpow2.f32 %v1099_v31 }
 0x3b9   : > { %v1320_v30 = vpop.eup %1319 }
 0x3ba   : > { %359 = vrot.lane.b32.xlu0 %v1320_v30, %s1386_s23 }
 0x3bb   : > { %v1322_v32 = vpop.eup %1321 }
 0x3bc   : > { %v353_v33 = vadd.f32 1.0, %v1322_v32 }
 0x3be   : > { %1323 = vrcp.f32 %v353_v33 }
 0x3c8   : > { %v1324_v34 = vpop.eup %1323 }
 0x3c9   : > { %v357_v37 = vmul.f32 %v1324_v34, %v263_v21 }
 0x42c   : > { %v360_v35 = vpop.permute.xlu0 %359 }
 0x42d   : > { %v362_v36 = vmul.f32 %v1324_v34, %v360_v35 }
 0x42f   : > { %364 = vrot.lane.b32.xlu1 %v362_v36, %s1387_s24 }
 0x4a1   : > { %v365_v38 = vpop.permute.xlu1 %364 }
 0x4a2   : > { %v367_v39 = vadd.f32 %v365_v38, %v357_v37  ;;  %v689_v38 = vld [vmem:[%s688_s14] sm:$0x3] }
 0x4a4   : > { %1325 = vtanh.f32 %v367_v39 }
 0x4ae   : > { %v1326_v40 = vpop.eup %1325 }
 0x4af   : > { %370 = vrot.lane.b32.xlu0 %v1326_v40, %s1386_s23 }
 0x521   : > { %v371_v41 = vpop.permute.xlu0 %370 }
 0x522   : > { %v373_v42 = vmul.f32 %v1324_v34, %v371_v41 }
 0x524   : > { %379 = vrot.lane.b32.xlu1 %v373_v42, %s1387_s24 }
 0x596   : > { %v380_v43 = vpop.permute.xlu1 %379 }
 0x597   : > { %1193 = vmatmul.mubr.msk.f32.vlgmr.msra.gmra.mrb[2].mxu0 %vm171_vm1, %v380_v43 }
 0x598   : > { %1276 = vmatpush3.bf16.msra.mxu0 %v1427_v5  ;;  %1214 = vmatprep.mubr.msk.f32.mxu0 %vm1384_vm0, %v1385_v1 }
 0x599   : > { %1277 = vmatprep.subr.bf16.mxu0 %v1383_v0 }
 0x59c   : > { %1279 = vmatpush3.bf16.msra.mxu0 %v1430_v7 }
 0x59d   : > { %1286 = vmatprep.subr.bf16.mxu0 %v1383_v0 }
 0x66a   : > { %v449_v45 = vpop.f32.mrb[2].mxu0 }
 0x66b   : > { %v453_v46 = vadd.f32 %v449_v45, %v377_v44  ;;  %v1194_v47 = vpop.f32.mrb[3].mxu0 }
 0x66d   : > { %1327 = vtanh.f32 %v453_v46  ;;  %v1102_v49 = vmul.f32 -1.442695, %v453_v46 }
 0x66f   : > { %1329 = vpow2.f32 %v1102_v49 }
 0x677   : > { %v1328_v48 = vpop.eup %1327 }
 0x678   : > { %463 = vrot.lane.b32.xlu0 %v1328_v48, %s1386_s23 }
 0x679   : > { %v1330_v50 = vpop.eup %1329 }
 0x67a   : > { %v457_v51 = vadd.f32 1.0, %v1330_v50 }
 0x67c   : > { %1331 = vrcp.f32 %v457_v51 }
 0x686   : > { %v1332_v52 = vpop.eup %1331 }
 0x687   : > { %v461_v55 = vmul.f32 %v1332_v52, %v367_v39 }
 0x6ea   : > { %v464_v53 = vpop.permute.xlu0 %463 }
 0x6eb   : > { %v466_v54 = vmul.f32 %v1332_v52, %v464_v53 }
 0x6ed   : > { %468 = vrot.lane.b32.xlu1 %v466_v54, %s1387_s24 }
 0x75f   : > { %v469_v56 = vpop.permute.xlu1 %468 }
 0x760   : > { %v471_v57 = vadd.f32 %v469_v56, %v461_v55 }
 0x762   : > { %1333 = vtanh.f32 %v471_v57 }
 0x76c   : > { %v1334_v58 = vpop.eup %1333 }
 0x76d   : > { %474 = vrot.lane.b32.xlu0 %v1334_v58, %s1386_s23 }
 0x7df   : > { %v475_v59 = vpop.permute.xlu0 %474 }
 0x7e0   : > { %v477_v60 = vmul.f32 %v1332_v52, %v475_v59  ;;  %v793_v52 = vld [vmem:[%s792_s17] sm:$0x3] }
 0x7e2   : > { %483 = vrot.lane.b32.xlu1 %v477_v60, %s1387_s24 }
 0x854   : > { %v484_v61 = vpop.permute.xlu1 %483 }
 0x855   : > { %1204 = vmatmul.mubr.msk.f32.vlgmr.msra.gmra.mrb[2].mxu1 %vm171_vm1, %v484_v61 }
 0x856   : > { %1282 = vmatpush3.bf16.msra.mxu1 %v1427_v5  ;;  %1225 = vmatprep.mubr.msk.f32.mxu1 %vm1384_vm0, %v1385_v1 }
 0x857   : > { %1283 = vmatprep.subr.bf16.mxu1 %v1383_v0 }
 0x85a   : > { %1285 = vmatpush3.bf16.msra.mxu1 %v1430_v7 }
 0x85b   : > { %1292 = vmatprep.subr.bf16.mxu1 %v1383_v0 }
 0x928   : > { %v553_v63 = vpop.f32.mrb[2].mxu1 }
 0x929   : > { %v557_v2 = vadd.f32 %v553_v63, %v481_v62  ;;  %v1205_v3 = vpop.f32.mrb[3].mxu1 }
 0x92b   : > { %1335 = vtanh.f32 %v557_v2  ;;  %v1105_v6 = vmul.f32 -1.442695, %v557_v2 }
 0x92d   : > { %1337 = vpow2.f32 %v1105_v6 }
 0x935   : > { %v1336_v4 = vpop.eup %1335 }
 0x936   : > { %567 = vrot.lane.b32.xlu0 %v1336_v4, %s1386_s23 }
 0x937   : > { %v1338_v8 = vpop.eup %1337 }
 0x938   : > { %v561_v9 = vadd.f32 1.0, %v1338_v8 }
 0x93a   : > { %1339 = vrcp.f32 %v561_v9 }
 0x944   : > { %v1340_v10 = vpop.eup %1339 }
 0x945   : > { %v565_v13 = vmul.f32 %v1340_v10, %v471_v57 }
 0x9a8   : > { %v568_v11 = vpop.permute.xlu0 %567 }
 0x9a9   : > { %v570_v12 = vmul.f32 %v1340_v10, %v568_v11 }
 0x9ab   : > { %572 = vrot.lane.b32.xlu1 %v570_v12, %s1387_s24 }
 0xa1d   : > { %v573_v14 = vpop.permute.xlu1 %572 }
 0xa1e   : > { %v575_v15 = vadd.f32 %v573_v14, %v565_v13 }
 0xa20   : > { %1341 = vtanh.f32 %v575_v15 }
 0xa2a   : > { %v1342_v16 = vpop.eup %1341 }
 0xa2b   : > { %578 = vrot.lane.b32.xlu0 %v1342_v16, %s1386_s23 }
 0xa9d   : > { %v579_v17 = vpop.permute.xlu0 %578 }
 0xa9e   : > { %v581_v18 = vmul.f32 %v1340_v10, %v579_v17  ;;  %v897_v10 = vld [vmem:[%s896_s21] sm:$0x3] }
 0xaa0   : > { %587 = vrot.lane.b32.xlu1 %v581_v18, %s1387_s24 }
 0xb12   : > { %v588_v19 = vpop.permute.xlu1 %587 }
 0xb13   : > { %1215 = vmatmul.mubr.msk.f32.vlgmr.msra.gmra.mrb[4].mxu0 %vm171_vm1, %v588_v19 }
 0xb14   : > { %1288 = vmatpush3.bf16.msra.mxu0 %v1427_v5  ;;  %1236 = vmatprep.mubr.msk.f32.mxu0 %vm1384_vm0, %v1385_v1 }
 0xb15   : > { %1289 = vmatprep.subr.bf16.mxu0 %v1383_v0 }
 0xb18   : > { %1291 = vmatpush3.bf16.msra.mxu0 %v1430_v7 }
 0xbe6   : > { %v657_v21 = vpop.f32.mrb[4].mxu0 }
 0xbe7   : > { %v661_v22 = vadd.f32 %v657_v21, %v585_v20  ;;  %v1216_v23 = vpop.f32.mrb[5].mxu0 }
 0xbe9   : > { %1343 = vtanh.f32 %v661_v22  ;;  %v1108_v25 = vmul.f32 -1.442695, %v661_v22 }
 0xbeb   : > { %1345 = vpow2.f32 %v1108_v25 }
 0xbf3   : > { %v1344_v24 = vpop.eup %1343 }
 0xbf4   : > { %671 = vrot.lane.b32.xlu0 %v1344_v24, %s1386_s23 }
 0xbf5   : > { %v1346_v26 = vpop.eup %1345 }
 0xbf6   : > { %v665_v27 = vadd.f32 1.0, %v1346_v26 }
 0xbf8   : > { %1347 = vrcp.f32 %v665_v27 }
 0xc02   : > { %v1348_v28 = vpop.eup %1347 }
 0xc03   : > { %v669_v31 = vmul.f32 %v1348_v28, %v575_v15 }
 0xc66   : > { %v672_v29 = vpop.permute.xlu0 %671 }
 0xc67   : > { %v674_v30 = vmul.f32 %v1348_v28, %v672_v29 }
 0xc69   : > { %676 = vrot.lane.b32.xlu1 %v674_v30, %s1387_s24 }
 0xcdb   : > { %v677_v32 = vpop.permute.xlu1 %676 }
 0xcdc   : > { %v679_v33 = vadd.f32 %v677_v32, %v669_v31 }
 0xcde   : > { %1349 = vtanh.f32 %v679_v33 }
 0xce8   : > { %v1350_v34 = vpop.eup %1349 }
 0xce9   : > { %682 = vrot.lane.b32.xlu0 %v1350_v34, %s1386_s23 }
 0xd5b   : > { %v683_v35 = vpop.permute.xlu0 %682 }
 0xd5c   : > { %v685_v36 = vmul.f32 %v1348_v28, %v683_v35 }
 0xd5e   : > { %691 = vrot.lane.b32.xlu1 %v685_v36, %s1387_s24 }
 0xdd0   : > { %v692_v37 = vpop.permute.xlu1 %691 }
 0xdd1   : > { %1226 = vmatmul.mubr.msk.f32.vlgmr.msra.gmra.mrb[4].mxu1 %vm171_vm1, %v692_v37 }
 0xdd2   : > { %1294 = vmatpush3.bf16.msra.mxu1 %v1427_v5  ;;  %1247 = vmatprep.mubr.msk.f32.mxu1 %vm1384_vm0, %v1385_v1 }
 0xdd3   : > { %1295 = vmatprep.subr.bf16.mxu1 %v1383_v0 }
 0xdd6   : > { %1297 = vmatpush3.bf16.msra.mxu1 %v1430_v7 }
 0xea4   : > { %v761_v39 = vpop.f32.mrb[4].mxu1 }
 0xea5   : > { %v765_v40 = vadd.f32 %v761_v39, %v689_v38  ;;  %v1227_v41 = vpop.f32.mrb[5].mxu1 }
 0xea7   : > { %1351 = vtanh.f32 %v765_v40  ;;  %v1111_v5 = vmul.f32 -1.442695, %v765_v40 }
 0xea9   : > { %1353 = vpow2.f32 %v1111_v5 }
 0xeb1   : > { %v1352_v42 = vpop.eup %1351 }
 0xeb2   : > { %775 = vrot.lane.b32.xlu0 %v1352_v42, %s1386_s23 }
 0xeb3   : > { %v1354_v43 = vpop.eup %1353 }
 0xeb4   : > { %v769_v1 = vadd.f32 1.0, %v1354_v43 }
 0xeb6   : > { %1355 = vrcp.f32 %v769_v1 }
 0xec0   : > { %v1356_v0 = vpop.eup %1355 }
 0xec1   : > { %v773_v45 = vmul.f32 %v1356_v0, %v679_v33 }
 0xf24   : > { %v776_v7 = vpop.permute.xlu0 %775 }
 0xf25   : > { %v778_v44 = vmul.f32 %v1356_v0, %v776_v7 }
 0xf27   : > { %780 = vrot.lane.b32.xlu1 %v778_v44, %s1387_s24 }
 0xf99   : > { %v781_v46 = vpop.permute.xlu1 %780 }
 0xf9a   : > { %v783_v47 = vadd.f32 %v781_v46, %v773_v45 }
 0xf9c   : > { %1357 = vtanh.f32 %v783_v47 }
 0xfa6   : > { %v1358_v48 = vpop.eup %1357 }
 0xfa7   : > { %786 = vrot.lane.b32.xlu0 %v1358_v48, %s1386_s23 }
0x1019   : > { %v787_v49 = vpop.permute.xlu0 %786 }
0x101a   : > { %v789_v50 = vmul.f32 %v1356_v0, %v787_v49 }
0x101c   : > { %795 = vrot.lane.b32.xlu1 %v789_v50, %s1387_s24 }
0x108e   : > { %v796_v51 = vpop.permute.xlu1 %795 }
0x108f   : > { %1237 = vmatmul.mubr.msk.f32.vlgmr.msra.gmra.mrb[6].mxu0 %vm171_vm1, %v796_v51 }
0x1162   : > { %v865_v53 = vpop.f32.mrb[6].mxu0 }
0x1163   : > { %v869_v54 = vadd.f32 %v865_v53, %v793_v52  ;;  %v1238_v55 = vpop.f32.mrb[7].mxu0 }
0x1165   : > { %1359 = vtanh.f32 %v869_v54  ;;  %v1114_v57 = vmul.f32 -1.442695, %v869_v54 }
0x1167   : > { %1361 = vpow2.f32 %v1114_v57 }
0x116f   : > { %v1360_v56 = vpop.eup %1359 }
0x1170   : > { %879 = vrot.lane.b32.xlu0 %v1360_v56, %s1386_s23 }
0x1171   : > { %v1362_v58 = vpop.eup %1361 }
0x1172   : > { %v873_v59 = vadd.f32 1.0, %v1362_v58 }
0x1174   : > { %1363 = vrcp.f32 %v873_v59 }
0x117e   : > { %v1364_v60 = vpop.eup %1363 }
0x117f   : > { %v877_v63 = vmul.f32 %v1364_v60, %v783_v47 }
0x11e2   : > { %v880_v61 = vpop.permute.xlu0 %879 }
0x11e3   : > { %v882_v62 = vmul.f32 %v1364_v60, %v880_v61 }
0x11e5   : > { %884 = vrot.lane.b32.xlu1 %v882_v62, %s1387_s24 }
0x1257   : > { %v885_v2 = vpop.permute.xlu1 %884 }
0x1258   : > { %v887_v3 = vadd.f32 %v885_v2, %v877_v63 }
0x125a   : > { %1365 = vtanh.f32 %v887_v3 }
0x1264   : > { %v1366_v4 = vpop.eup %1365 }
0x1265   : > { %890 = vrot.lane.b32.xlu0 %v1366_v4, %s1386_s23 }
0x12d7   : > { %v891_v6 = vpop.permute.xlu0 %890 }
0x12d8   : > { %v893_v8 = vmul.f32 %v1364_v60, %v891_v6 }
0x12da   : > { %899 = vrot.lane.b32.xlu1 %v893_v8, %s1387_s24 }
0x134c   : > { %v900_v9 = vpop.permute.xlu1 %899 }
0x134d   : > { %1248 = vmatmul.mubr.msk.f32.vlgmr.msra.gmra.mrb[6].mxu1 %vm171_vm1, %v900_v9 }
0x1420   : > { %v969_v11 = vpop.f32.mrb[6].mxu1 }
0x1421   : > { %v973_v12 = vadd.f32 %v969_v11, %v897_v10  ;;  %v1249_v13 = vpop.f32.mrb[7].mxu1 }
0x1423   : > { %1367 = vtanh.f32 %v973_v12  ;;  %v1117_v15 = vmul.f32 -1.442695, %v973_v12 }
0x1425   : > { %1369 = vpow2.f32 %v1117_v15 }
0x142d   : > { %v1368_v14 = vpop.eup %1367 }
0x142e   : > { %983 = vrot.lane.b32.xlu0 %v1368_v14, %s1386_s23 }
0x142f   : > { %v1370_v16 = vpop.eup %1369 }
0x1430   : > { %v977_v17 = vadd.f32 1.0, %v1370_v16 }
0x1432   : > { %1371 = vrcp.f32 %v977_v17 }
0x143c   : > { %v1372_v18 = vpop.eup %1371 }
0x143d   : > { %v981_v21 = vmul.f32 %v1372_v18, %v887_v3 }
0x14a0   : > { %v984_v19 = vpop.permute.xlu0 %983 }
0x14a1   : > { %v986_v20 = vmul.f32 %v1372_v18, %v984_v19 }
0x14a3   : > { %988 = vrot.lane.b32.xlu1 %v986_v20, %s1387_s24 }
0x1515   : > { %v989_v22 = vpop.permute.xlu1 %988 }
0x1516   : > { %v991_v23 = vadd.f32 %v989_v22, %v981_v21 }
0x1518   : > { %1373 = vtanh.f32 %v991_v23 }
0x1522   : > { %v1374_v24 = vpop.eup %1373 }
0x1523   : > { %994 = vrot.lane.b32.xlu0 %v1374_v24, %s1386_s23 }
0x1595   : > { %v995_v25 = vpop.permute.xlu0 %994 }
0x1596   : > { %v997_v26 = vmul.f32 %v1372_v18, %v995_v25 }
0x1598   : > { %999 = vrot.lane.b32.xlu1 %v997_v26, %s1387_s24 }
0x160a   : > { %v1000_v27 = vpop.permute.xlu1 %999 }
0x160b   : > { %1003 = vst.msk [vmem:[%s161_s25] sm:$0x3] %vm1002_vm2, %v1000_v27 }
0x160c PF: > { %s12_s9 = sadd.s32 1, %s1381_s9  }
0x160d   : > { %p9_p5 = scmp.ge.s32.totalorder %s12_s9, 4  }
0x160f   :  { %11 = sbr.rel (!%p9_p5) target bundleno = 1 (0x1), region = 69 }

// kernel: lstm_model_forward.9
= control target key start
LH: loop header
LB: loop body
LE: loop exit
PB: predicated region body
PF: predicated region fallthrough
CT: control target
= control target key end

     0   :  { %v244_v0 = vmov 0.0|0.0   ;;  %vm245_vm0 = vmmov 0   ;;  %v246_v8 = vmov 0.0   ;;  %vm28_vm1 = vcmask 261120   ;;  %s303_s1 = inlined_call_operand.vmem [shape: f32[2,32,1], index: 1, kind: input, shape index: {}]   ;;  %s304_s0 = inlined_call_operand.vmem [shape: f32[2,2,32], index: 0, kind: input, shape index: {}]   ;;  %s305_s2 = inlined_call_operand.<no memory space> [shape: f32[1,1], index: 2, kind: input, shape index: {}]   ;;  %s306_s3 = inlined_call_operand.vmem [shape: f32[2,1], index: 3, kind: output, shape index: {}]  }
   0x1   :  { %229 = vmatprep.subr.bf16.mxu0 %v244_v0  ;;  %235 = vmatprep.subr.bf16.mxu1 %v244_v0  ;;  %v190_v1 = vld [vmem:[%s303_s1 + $0x20] sm:$0xff]  ;;  %v191_v2 = vld [vmem:[%s303_s1 + $0x28] sm:$0xff]  ;;  %v192_v6 = vld [vmem:[%s303_s1 + $0x30] sm:$0xff]  ;;  %v8_v16 = vstv %s305_s2  ;;  %vm183_vm2 = vcmask 1024  }
   0x2   :  { %v17_v3 = vld [vmem:[%s303_s1] sm:$0xff]  ;;  %v230_v4 = vpack.c.bf16 %v191_v2, %v190_v1  ;;  %v18_v5 = vld [vmem:[%s303_s1 + $0x8] sm:$0xff]  ;;  %v193_v7 = vld [vmem:[%s303_s1 + $0x38] sm:$0xff]  ;;  %215 = vmatprep.mubr.msk.f32.mxu0 %vm245_vm0, %v246_v8  ;;  %226 = vmatprep.mubr.msk.f32.mxu1 %vm245_vm0, %v246_v8  ;;  %9 = vst [vmem:[#allocation2] sm:$0x1] %v8_v16 }
   0x3   :  { %v236_v9 = vpack.c.bf16 %v18_v5, %v17_v3  ;;  %v19_v10 = vld [vmem:[%s303_s1 + $0x10] sm:$0xff]  ;;  %v20_v11 = vld [vmem:[%s303_s1 + $0x18] sm:$0xff]  ;;  %v233_v12 = vpack.c.bf16 %v193_v7, %v192_v6  ;;  %v189_v14 = vld [vmem:[%s304_s0 + $0x2] sm:$0x3] }
   0x4   :  { %231 = vmatpush3.bf16.msra.mxu0 %v230_v4  ;;  %v239_v13 = vpack.c.bf16 %v20_v11, %v19_v10  ;;  %v16_v15 = vld [vmem:[%s304_s0] sm:$0x3] }
   0x5   :  { %237 = vmatpush3.bf16.msra.mxu1 %v236_v9  ;;  %232 = vmatprep.subr.bf16.mxu0 %v244_v0 }
   0x6   :  { %238 = vmatprep.subr.bf16.mxu1 %v244_v0 }
   0x8   :  { %234 = vmatpush3.bf16.msra.mxu0 %v233_v12 }
   0x9   :  { %240 = vmatpush3.bf16.msra.mxu1 %v239_v13  ;;  %v196_v19 = vld [vmem:[#allocation2] ss:$0 sm:$0xff] }
   0xb   :  { %216 = vmatmul.mubr.msk.f32.vlgmr.msra.gmra.mrb[0].mxu0 %vm28_vm1, %v189_v14 }
   0xc   :  { %227 = vmatmul.mubr.msk.f32.vlgmr.msra.gmra.mrb[0].mxu1 %vm28_vm1, %v16_v15 }
  0xde   :  { %v98_v17 = vpop.f32.mrb[0].mxu0 }
  0xdf   :  { %v171_v18 = vpop.f32.mrb[0].mxu1  ;;  %v217_v20 = vpop.f32.mrb[1].mxu0 }
  0xe0   :  { %v172_v21 = vadd.f32 %v171_v18, %v98_v17  ;;  %v228_v22 = vpop.f32.mrb[1].mxu1 }
  0xe2   :  { %v182_v23 = vadd.f32 %v196_v19, %v172_v21 }
  0xe4   :  { %184 = vst.msk [vmem:[%s306_s3] sm:$0x3] %vm183_vm2, %v182_v23 }

</bundles_post_ra>
